<compile_context>
chip_gen: v7x
topology: tpu7x:2x2x1
jax: 0.10.0
libtpu: 0.0.40
codegen_flags: <defaults>
</compile_context>

<pallas_src>
import functools
import re

import jax
import jax.numpy as jnp
from jax.experimental import pallas as pl
from jax.experimental.pallas import tpu as pltpu


# ----------------------------------------------------------------------------
# Generation detection & batch-tile selection
# ----------------------------------------------------------------------------

def _tpu_generation(default: int = 6) -> int:
    """Best-effort TPU generation from device_kind ('TPU v5e' -> 5, 'TPU7x' -> 7)."""
    try:
        kind = jax.devices()[0].device_kind.lower()
    except Exception:
        return default
    m = re.search(r"(\d+)", kind)
    return int(m.group(1)) if m else default


def _divisor_tile(batch: int, cap: int, grid_multiple: int = 1):
    """Largest multiple-of-8 divisor of `batch` that is <= cap and yields a grid
    size divisible by `grid_multiple`; None if there is no such divisor."""
    t = min(cap, batch)
    t -= t % 8
    while t >= 8:
        if batch % t == 0 and (batch // t) % grid_multiple == 0:
            return t
        t -= 8
    return None


def _pick_batch_tile(batch: int, gen: int) -> int:
    """Generation-aware batch tile.

    v5e/v6e: grid=1 whenever the batch fits the cap (single TensorCore -> the
    grid is a serial loop, extra steps are pure overhead).
    v7x: tile that gives an even grid >= 2 so "parallel" shards across both TCs.
    """
    num_cores = 2 if gen >= 7 else 1           # v7x: 2 TensorCores per chip
    cap = 1024 if gen <= 5 else 2048           # v5e: single vst slot -> smaller cap

    if num_cores > 1 and batch >= 16:
        t = _divisor_tile(batch, min(cap, batch // num_cores),
                          grid_multiple=num_cores)
        if t is not None:
            return t

    if batch <= cap:
        return batch                            # grid=1: fewest steps on one TC
    t = _divisor_tile(batch, cap)
    if t is not None:
        return t
    if batch <= 4 * cap:
        return batch                            # awkward factorization, still fits VMEM
    raise ValueError(
        f"batch={batch} has no multiple-of-8 tile <= {cap}; pad the batch or "
        "pass batch_tile= explicitly")


# ----------------------------------------------------------------------------
# Parameter slab packing (10 tiny inputs -> 1 weight slab + 1 bias slab)
# ----------------------------------------------------------------------------

def _round_up(x: int, m: int) -> int:
    return ((x + m - 1) // m) * m


def _pack_params(weights, biases, compute_dtype):
    """Pack all layer weights into one (sum_k_pad, n_pad) slab of `compute_dtype`
    and all biases into one (n_layers, n_pad) f32 slab.

    Each layer's rows start at a sublane-tile-aligned offset so the in-kernel
    static slices land on tile boundaries. Padded rows/columns are zero, so the
    extra output columns of the last layer are exactly zero and are sliced away.
    """
    n_layers = len(weights)
    n_pad = max(w.shape[1] for w in weights)
    k_dims = [w.shape[0] for w in weights]
    row_align = 16 if jnp.dtype(compute_dtype).itemsize == 2 else 8
    k_pads = [_round_up(k, row_align) for k in k_dims]
    row_offsets = [0]
    for kp in k_pads[:-1]:
        row_offsets.append(row_offsets[-1] + kp)
    total_rows = sum(k_pads)

    w_slab = jnp.zeros((total_rows, n_pad), dtype=compute_dtype)
    b_slab = jnp.zeros((n_layers, n_pad), dtype=jnp.float32)
    for i, (w, b) in enumerate(zip(weights, biases)):
        k, n = w.shape
        w_slab = w_slab.at[row_offsets[i]:row_offsets[i] + k, :n].set(
            w.astype(compute_dtype))
        b_slab = b_slab.at[i, :n].set(b.astype(jnp.float32))
    return w_slab, b_slab, k_dims, row_offsets, n_pad


# ----------------------------------------------------------------------------
# Kernel
# ----------------------------------------------------------------------------

def _make_mlp_kernel(layer_in_dims, layer_row_offsets, out_dim, last_act,
                     compute_dtype):
    """Kernel over refs: (x, w_slab, b_slab, out)."""
    n_layers = len(layer_in_dims)

    def kernel(x_ref, w_ref, b_ref, o_ref):
        # Carry the hidden state in bf16 (half the vreg footprint); the dot
        # accumulates in f32 on the MXU and bias+ReLU happen in f32 (safe on
        # v5e, which has no bf16 VPU -- only the pack/cast touches bf16 there).
        h = x_ref[...].astype(compute_dtype)                  # (tile, in_dim)
        acc = None
        for layer in range(n_layers):
            k = layer_in_dims[layer]
            off = layer_row_offsets[layer]
            w = w_ref[off:off + k, :]                          # static slice, (k, n_pad)
            b = b_ref[layer:layer + 1, :]                      # (1, n_pad) f32
            acc = jnp.dot(h, w, preferred_element_type=jnp.float32) + b
            if layer < n_layers - 1 or last_act:
                acc = jnp.maximum(acc, 0.0)                    # ReLU on the VPU, f32
            if layer < n_layers - 1:
                h = acc.astype(compute_dtype)
        # Padded output columns of the last layer are exactly zero; drop them.
        # TODO(synk): out_dim=8 -> lane-sparse masked stores; a lane-dense repack
        # is not worth the XLU work at these sizes (see perf review).
        o_ref[...] = acc[:, :out_dim].astype(o_ref.dtype)

    return kernel


# ----------------------------------------------------------------------------
# Wrapper
# ----------------------------------------------------------------------------

def regression_nn_forward(x, weights, biases, *, last_act=False, batch_tile=None,
                          compute_dtype=jnp.bfloat16):
    """Run the fused MLP kernel.

    x:       (B, input_dim) float32
    weights: list of (in_i, out_i) float32 arrays (transposed vs PyTorch nn.Linear)
    biases:  list of (out_i,) float32 arrays
    Pass compute_dtype=jnp.float32 to disable bf16 MXU inputs (precision fallback).
    """
    n_layers = len(weights)
    assert len(biases) == n_layers
    B, in_dim = x.shape
    out_dim = weights[-1].shape[1]

    gen = _tpu_generation()
    if batch_tile is None:
        batch_tile = _pick_batch_tile(B, gen)
    if B % batch_tile != 0:
        raise ValueError(f"batch {B} must be divisible by batch_tile {batch_tile}")
    if batch_tile != B and batch_tile % 8 != 0:
        raise ValueError("batch_tile must be a multiple of 8 (f32 sublane) "
                         "unless it equals the full batch")
    grid = (B // batch_tile,)

    w_slab, b_slab, k_dims, row_offsets, n_pad = _pack_params(
        weights, biases, compute_dtype)

    in_specs = [
        pl.BlockSpec((batch_tile, in_dim), lambda i: (i, 0)),
        # Grid-invariant parameter slabs: one block each, constant index map.
        pl.BlockSpec(w_slab.shape, lambda i: (0, 0)),
        pl.BlockSpec(b_slab.shape, lambda i: (0, 0)),
    ]
    out_spec = pl.BlockSpec((batch_tile, out_dim), lambda i: (i, 0))

    # Advisory cost estimate for XLA's scheduler.
    it_x = jnp.dtype(x.dtype).itemsize
    it_w = jnp.dtype(compute_dtype).itemsize
    flops = 2 * B * sum(w.shape[0] * w.shape[1] for w in weights)
    bytes_accessed = int(B * in_dim * it_x + B * out_dim * it_x
                         + w_slab.size * it_w + b_slab.size * 4)
    cost = pl.CostEstimate(flops=flops, transcendentals=0,
                           bytes_accessed=bytes_accessed)

    # Actual VMEM need: double-buffered input/output tiles, double-buffered
    # (grid-invariant) parameter slabs, plus a few live activation copies.
    # 100% headroom, 4 MiB floor -- no blanket 32 MiB request.
    need = (2 * batch_tile * in_dim * it_x
            + 2 * batch_tile * out_dim * it_x
            + 2 * w_slab.size * it_w
            + 2 * b_slab.size * 4
            + 4 * batch_tile * n_pad * 4)
    vmem_limit = int(max(2 * need, 4 * 1024 * 1024))

    kernel = _make_mlp_kernel(k_dims, row_offsets, out_dim, last_act, compute_dtype)

    return pl.pallas_call(
        kernel,
        out_shape=jax.ShapeDtypeStruct((B, out_dim), x.dtype),
        grid_spec=pltpu.PrefetchScalarGridSpec(
            num_scalar_prefetch=0,
            grid=grid,
            in_specs=in_specs,
            out_specs=out_spec,
        ),
        compiler_params=pltpu.CompilerParams(
            dimension_semantics=("parallel",),
            vmem_limit_bytes=vmem_limit,
        ),
        cost_estimate=cost,
    )(x, w_slab, b_slab)


# ----------------------------------------------------------------------------
# Param init (matches the PyTorch nn.Sequential layout) & pure-JAX reference
# ----------------------------------------------------------------------------

def init_regression_nn_params(key, input_dim, output_dim,
                              intermediate_dim=64, intermediate_layers=4):
    """Linear(input_dim, D), [Linear(D, D)] x (intermediate_layers - 1),
    Linear(D, output_dim) -- PyTorch-style uniform(+-1/sqrt(fan_in)) init."""
    dims = ([input_dim]
            + [intermediate_dim] * intermediate_layers
            + [output_dim])
    weights, biases = [], []
    for i in range(len(dims) - 1):
        key, wk, bk = jax.random.split(key, 3)
        fan_in = dims[i]
        bound = 1.0 / jnp.sqrt(fan_in)
        # Stored directly as (in, out) == W^T of PyTorch's (out, in) weight.
        w = jax.random.uniform(wk, (dims[i], dims[i + 1]),
                               minval=-bound, maxval=bound, dtype=jnp.float32)
        b = jax.random.uniform(bk, (dims[i + 1],),
                               minval=-bound, maxval=bound, dtype=jnp.float32)
        weights.append(w)
        biases.append(b)
    return weights, biases


def regression_nn_reference(x, weights, biases, last_act=False):
    h = x
    n = len(weights)
    for i, (w, b) in enumerate(zip(weights, biases)):
        h = h @ w + b
        if i < n - 1 or last_act:
            h = jnp.maximum(h, 0.0)
    return h


if __name__ == "__main__":
    key = jax.random.PRNGKey(0)

    batch = 512                  # grid=1 on v5e/v6e, grid=2 (even) on v7x
    input_dim = 16
    output_dim = 8
    intermediate_dim = 64
    intermediate_layers = 4

    key, xk = jax.random.split(key)
    x = jax.random.normal(xk, (batch, input_dim), dtype=jnp.float32)

    weights, biases = init_regression_nn_params(
        key, input_dim, output_dim,
        intermediate_dim=intermediate_dim,
        intermediate_layers=intermediate_layers,
    )

    fwd = jax.jit(functools.partial(regression_nn_forward, last_act=False))
    out = fwd(x, weights, biases)
    out = jax.block_until_ready(out)

    ref = regression_nn_reference(x, weights, biases, last_act=False)
    assert out.shape == (batch, output_dim), out.shape
    # bf16 MXU inputs with f32 accumulation -> relaxed (but still tight enough
    # to catch real bugs) tolerance vs the pure-f32 reference.
    assert jnp.allclose(out, ref, atol=5e-2, rtol=5e-2), (
        "mismatch vs reference: max abs err "
        f"{float(jnp.max(jnp.abs(out - ref)))}")

    print("KERNEL_OK")
</pallas_src>

<mosaic_0001>
module attributes {stable_mosaic.version = 11 : i64} {
  func.func @kernel(%arg0: i32, %arg1: memref<512x16xf32, #tpu.memory_space<vmem>>, %arg2: memref<272x64xbf16, #tpu.memory_space<vmem>>, %arg3: memref<5x64xf32, #tpu.memory_space<vmem>>, %arg4: memref<512x8xf32, #tpu.memory_space<vmem>>) attributes {dimension_semantics = [#tpu.dimension_semantics<parallel>], iteration_bounds = array<i64: 1>, scalar_prefetch = 0 : i64, scratch_operands = 0 : i64, tpu.core_type = #tpu.core_type<tc>, window_params = [{transform_indices = @transform_0, window_bounds = array<i64: 512, 16>}, {pipeline_mode = #tpu.pipeline_mode<synchronous>, transform_indices = @transform_1, window_bounds = array<i64: 272, 64>}, {pipeline_mode = #tpu.pipeline_mode<synchronous>, transform_indices = @transform_2, window_bounds = array<i64: 5, 64>}, {transform_indices = @transform_3, window_bounds = array<i64: 512, 8>}]} {
    %c0 = arith.constant 0 : index
    %c0_0 = arith.constant 0 : index
    %0 = vector.load %arg1[%c0, %c0_0] : memref<512x16xf32, #tpu.memory_space<vmem>>, vector<512x16xf32>
    %1 = arith.truncf %0 : vector<512x16xf32> to vector<512x16xbf16>
    %c0_1 = arith.constant 0 : index
    %c0_2 = arith.constant 0 : index
    %2 = vector.load %arg2[%c0_1, %c0_2] : memref<272x64xbf16, #tpu.memory_space<vmem>>, vector<16x64xbf16>
    %c0_3 = arith.constant 0 : index
    %c0_4 = arith.constant 0 : index
    %3 = vector.load %arg3[%c0_3, %c0_4] : memref<5x64xf32, #tpu.memory_space<vmem>>, vector<1x64xf32>
    %cst = arith.constant dense<0.000000e+00> : vector<512x64xf32>
    %4 = tpu.matmul %1, %2, %cst {dimension_numbers = #tpu.dot_dimension_numbers<[1], [0], [0], [1], [0, 0, 1, 1], [], []>} : vector<512x16xbf16>, vector<16x64xbf16>, vector<512x64xf32> -> vector<512x64xf32>
    %5 = vector.broadcast %3 : vector<1x64xf32> to vector<512x64xf32>
    %6 = arith.addf %4, %5 : vector<512x64xf32>
    %cst_5 = arith.constant 0.000000e+00 : f32
    %7 = vector.broadcast %cst_5 : f32 to vector<512x64xf32>
    %8 = arith.maximumf %6, %7 : vector<512x64xf32>
    %9 = arith.truncf %8 : vector<512x64xf32> to vector<512x64xbf16>
    %c16 = arith.constant 16 : index
    %c0_6 = arith.constant 0 : index
    %10 = vector.load %arg2[%c16, %c0_6] : memref<272x64xbf16, #tpu.memory_space<vmem>>, vector<64x64xbf16>
    %c1 = arith.constant 1 : index
    %c0_7 = arith.constant 0 : index
    %11 = vector.load %arg3[%c1, %c0_7] : memref<5x64xf32, #tpu.memory_space<vmem>>, vector<1x64xf32>
    %cst_8 = arith.constant dense<0.000000e+00> : vector<512x64xf32>
    %12 = tpu.matmul %9, %10, %cst_8 {dimension_numbers = #tpu.dot_dimension_numbers<[1], [0], [0], [1], [0, 0, 1, 1], [], []>} : vector<512x64xbf16>, vector<64x64xbf16>, vector<512x64xf32> -> vector<512x64xf32>
    %13 = vector.broadcast %11 : vector<1x64xf32> to vector<512x64xf32>
    %14 = arith.addf %12, %13 : vector<512x64xf32>
    %cst_9 = arith.constant 0.000000e+00 : f32
    %15 = vector.broadcast %cst_9 : f32 to vector<512x64xf32>
    %16 = arith.maximumf %14, %15 : vector<512x64xf32>
    %17 = arith.truncf %16 : vector<512x64xf32> to vector<512x64xbf16>
    %c80 = arith.constant 80 : index
    %c0_10 = arith.constant 0 : index
    %18 = vector.load %arg2[%c80, %c0_10] : memref<272x64xbf16, #tpu.memory_space<vmem>>, vector<64x64xbf16>
    %c2 = arith.constant 2 : index
    %c0_11 = arith.constant 0 : index
    %19 = vector.load %arg3[%c2, %c0_11] : memref<5x64xf32, #tpu.memory_space<vmem>>, vector<1x64xf32>
    %cst_12 = arith.constant dense<0.000000e+00> : vector<512x64xf32>
    %20 = tpu.matmul %17, %18, %cst_12 {dimension_numbers = #tpu.dot_dimension_numbers<[1], [0], [0], [1], [0, 0, 1, 1], [], []>} : vector<512x64xbf16>, vector<64x64xbf16>, vector<512x64xf32> -> vector<512x64xf32>
    %21 = vector.broadcast %19 : vector<1x64xf32> to vector<512x64xf32>
    %22 = arith.addf %20, %21 : vector<512x64xf32>
    %cst_13 = arith.constant 0.000000e+00 : f32
    %23 = vector.broadcast %cst_13 : f32 to vector<512x64xf32>
    %24 = arith.maximumf %22, %23 : vector<512x64xf32>
    %25 = arith.truncf %24 : vector<512x64xf32> to vector<512x64xbf16>
    %c144 = arith.constant 144 : index
    %c0_14 = arith.constant 0 : index
    %26 = vector.load %arg2[%c144, %c0_14] : memref<272x64xbf16, #tpu.memory_space<vmem>>, vector<64x64xbf16>
    %c3 = arith.constant 3 : index
    %c0_15 = arith.constant 0 : index
    %27 = vector.load %arg3[%c3, %c0_15] : memref<5x64xf32, #tpu.memory_space<vmem>>, vector<1x64xf32>
    %cst_16 = arith.constant dense<0.000000e+00> : vector<512x64xf32>
    %28 = tpu.matmul %25, %26, %cst_16 {dimension_numbers = #tpu.dot_dimension_numbers<[1], [0], [0], [1], [0, 0, 1, 1], [], []>} : vector<512x64xbf16>, vector<64x64xbf16>, vector<512x64xf32> -> vector<512x64xf32>
    %29 = vector.broadcast %27 : vector<1x64xf32> to vector<512x64xf32>
    %30 = arith.addf %28, %29 : vector<512x64xf32>
    %cst_17 = arith.constant 0.000000e+00 : f32
    %31 = vector.broadcast %cst_17 : f32 to vector<512x64xf32>
    %32 = arith.maximumf %30, %31 : vector<512x64xf32>
    %33 = arith.truncf %32 : vector<512x64xf32> to vector<512x64xbf16>
    %c208 = arith.constant 208 : index
    %c0_18 = arith.constant 0 : index
    %34 = vector.load %arg2[%c208, %c0_18] : memref<272x64xbf16, #tpu.memory_space<vmem>>, vector<64x64xbf16>
    %c4 = arith.constant 4 : index
    %c0_19 = arith.constant 0 : index
    %35 = vector.load %arg3[%c4, %c0_19] : memref<5x64xf32, #tpu.memory_space<vmem>>, vector<1x64xf32>
    %cst_20 = arith.constant dense<0.000000e+00> : vector<512x64xf32>
    %36 = tpu.matmul %33, %34, %cst_20 {dimension_numbers = #tpu.dot_dimension_numbers<[1], [0], [0], [1], [0, 0, 1, 1], [], []>} : vector<512x64xbf16>, vector<64x64xbf16>, vector<512x64xf32> -> vector<512x64xf32>
    %37 = vector.broadcast %35 : vector<1x64xf32> to vector<512x64xf32>
    %38 = arith.addf %36, %37 : vector<512x64xf32>
    %39 = vector.extract_strided_slice %38 {offsets = [0, 0], sizes = [512, 8], strides = [1, 1]} : vector<512x64xf32> to vector<512x8xf32>
    %c0_21 = arith.constant 0 : index
    %c0_22 = arith.constant 0 : index
    %40 = vector.load %arg4[%c0_21, %c0_22] : memref<512x8xf32, #tpu.memory_space<vmem>>, vector<512x8xf32>
    tpu.vector_store %arg4[%c0_21, %c0_22], %39 {strides = array<i32>} : memref<512x8xf32, #tpu.memory_space<vmem>>, vector<512x8xf32>,
    return
  }
  func.func @transform_0(%arg0: i32) -> (i32, i32) {
    %c0_i32 = arith.constant 0 : i32
    %c0_i32_0 = arith.constant 0 : i32
    return %arg0, %c0_i32 : i32, i32
  }
  func.func @transform_1(%arg0: i32) -> (i32, i32) {
    %c0_i32 = arith.constant 0 : i32
    %c0_i32_0 = arith.constant 0 : i32
    %c0_i32_1 = arith.constant 0 : i32
    return %c0_i32, %c0_i32_0 : i32, i32
  }
  func.func @transform_2(%arg0: i32) -> (i32, i32) {
    %c0_i32 = arith.constant 0 : i32
    %c0_i32_0 = arith.constant 0 : i32
    %c0_i32_1 = arith.constant 0 : i32
    return %c0_i32, %c0_i32_0 : i32, i32
  }
  func.func @transform_3(%arg0: i32) -> (i32, i32) {
    %c0_i32 = arith.constant 0 : i32
    %c0_i32_0 = arith.constant 0 : i32
    return %arg0, %c0_i32 : i32, i32
  }
}

</mosaic_0001>

<bundles_post_ra>
// kernel: regression_nn_forward.1
= control target key start
LH: loop header
LB: loop body
LE: loop exit
PB: predicated region body
PF: predicated region fallthrough
CT: control target
= control target key end

     0   :  { %vm124_vm0 = vcmask 130048   ;;  %vm643_vm1 = vcmask 523264   ;;  %vm2583_vm2 = vcmask 64512   ;;  %s4438_s1 = inlined_call_operand.vmem [shape: bf16[272,64], index: 1, kind: input, shape index: {}]   ;;  %s4439_s0 = inlined_call_operand.vmem [shape: f32[512,16], index: 0, kind: input, shape index: {}]   ;;  %s4440_s2 = inlined_call_operand.vmem [shape: f32[5,64], index: 2, kind: input, shape index: {}]   ;;  %s4441_s3 = inlined_call_operand.vmem [shape: f32[512,8], index: 3, kind: output, shape index: {}]  }
   0x1   :  { %v3367_v0 = vld [vmem:[%s4438_s1] sm:$0xff]   ;;  %v16_v2 = vld [vmem:[%s4439_s0 + $0x8] sm:$0xff]  ;;  %v17_v3 = vld [vmem:[%s4439_s0 + $0x10] sm:$0xff] }
   0x2   :  { %v15_v1 = vld [vmem:[%s4439_s0] sm:$0xff]  ;;  %3011 = vmatprep.subr.bf16.mxu0 %v3367_v0  ;;  %v18_v5 = vld [vmem:[%s4439_s0 + $0x18] sm:$0xff]  ;;  %v20_v7 = vld [vmem:[%s4439_s0 + $0x28] sm:$0xff]  ;;  %3365 = vmatprep.subr.bf16.mxu1 %v3367_v0 }
   0x3   :  { %v79_v4 = vpack.c.bf16 %v16_v2, %v15_v1  ;;  %v19_v6 = vld [vmem:[%s4439_s0 + $0x20] sm:$0xff]  ;;  %3012 = vmatpush3.bf16.msra.mxu0 %v3367_v0  ;;  %v80_v8 = vpack.c.bf16 %v18_v5, %v17_v3  ;;  %3366 = vmatpush3.bf16.msra.mxu1 %v3367_v0  ;;  %v21_v10 = vld [vmem:[%s4439_s0 + $0x30] sm:$0xff]  ;;  %v22_v11 = vld [vmem:[%s4439_s0 + $0x38] sm:$0xff] }
   0x4   :  { %v81_v9 = vpack.c.bf16 %v20_v7, %v19_v6  ;;  %v23_v12 = vld [vmem:[%s4439_s0 + $0x40] sm:$0xff]  ;;  %v24_v13 = vld [vmem:[%s4439_s0 + $0x48] sm:$0xff]  ;;  %v82_v14 = vpack.c.bf16 %v22_v11, %v21_v10  ;;  %v49_v18 = vld [vmem:[%s4439_s0 + $0x110] sm:$0xff] }
   0x5   :  { %3013 = vmatprep.mubr.msk.bf16.mxu0 %vm124_vm0, %v79_v4  ;;  %v83_v15 = vpack.c.bf16 %v24_v13, %v23_v12  ;;  %v47_v16 = vld [vmem:[%s4439_s0 + $0x100] sm:$0xff]  ;;  %v48_v17 = vld [vmem:[%s4439_s0 + $0x108] sm:$0xff]  ;;  %v50_v19 = vld [vmem:[%s4439_s0 + $0x118] sm:$0xff] }
   0x6   :  { %3014 = vmatmul.mubr.msk.bf16.vlgmr.msra.gmra.mrb[0].mxu0 %vm124_vm0, %v80_v8  ;;  %v95_v20 = vpack.c.bf16 %v48_v17, %v47_v16  ;;  %v96_v21 = vpack.c.bf16 %v50_v19, %v49_v18  ;;  %v51_v22 = vld [vmem:[%s4439_s0 + $0x120] sm:$0xff]  ;;  %v52_v23 = vld [vmem:[%s4439_s0 + $0x128] sm:$0xff]  ;;  %v25_v25 = vld [vmem:[%s4439_s0 + $0x50] sm:$0xff] }
   0x7   :  { %3017 = vmatprep.mubr.msk.bf16.mxu0 %vm124_vm0, %v81_v9  ;;  %v97_v24 = vpack.c.bf16 %v52_v23, %v51_v22  ;;  %v26_v26 = vld [vmem:[%s4439_s0 + $0x58] sm:$0xff]  ;;  %v27_v27 = vld [vmem:[%s4439_s0 + $0x60] sm:$0xff]  ;;  %v28_v28 = vld [vmem:[%s4439_s0 + $0x68] sm:$0xff] }
   0x8   :  { %3045 = vmatprep.mubr.msk.bf16.mxu1 %vm124_vm0, %v95_v20  ;;  %v53_v29 = vld [vmem:[%s4439_s0 + $0x130] sm:$0xff]  ;;  %v54_v30 = vld [vmem:[%s4439_s0 + $0x138] sm:$0xff]  ;;  %v84_v31 = vpack.c.bf16 %v26_v26, %v25_v25  ;;  %v55_v32 = vld [vmem:[%s4439_s0 + $0x140] sm:$0xff]  ;;  %v85_v34 = vpack.c.bf16 %v28_v28, %v27_v27 }
   0x9   :  { %3046 = vmatmul.mubr.msk.bf16.vlgmr.msra.gmra.mrb[0].mxu1 %vm124_vm0, %v96_v21  ;;  %v56_v33 = vld [vmem:[%s4439_s0 + $0x148] sm:$0xff]  ;;  %v98_v35 = vpack.c.bf16 %v54_v30, %v53_v29  ;;  %v29_v36 = vld [vmem:[%s4439_s0 + $0x70] sm:$0xff]  ;;  %v30_v37 = vld [vmem:[%s4439_s0 + $0x78] sm:$0xff] }
   0xa   :  { %3049 = vmatprep.mubr.msk.bf16.mxu1 %vm124_vm0, %v97_v24  ;;  %v99_v38 = vpack.c.bf16 %v56_v33, %v55_v32  ;;  %v31_v39 = vld [vmem:[%s4439_s0 + $0x80] sm:$0xff]  ;;  %v32_v40 = vld [vmem:[%s4439_s0 + $0x88] sm:$0xff]  ;;  %v57_v41 = vld [vmem:[%s4439_s0 + $0x150] sm:$0xff]  ;;  %v86_v47 = vpack.c.bf16 %v30_v37, %v29_v36 }
   0xb   :  { %v58_v42 = vld [vmem:[%s4439_s0 + $0x158] sm:$0xff]  ;;  %v3368_v43 = vld [vmem:[%s4438_s1 + $0x8] sm:$0xff]   ;;  %v59_v44 = vld [vmem:[%s4439_s0 + $0x160] sm:$0xff]  ;;  %v87_v49 = vpack.c.bf16 %v32_v40, %v31_v39 }
   0xc   :  { %v3369_v45 = vld [vmem:[%s4438_s1 + $0x10] sm:$0xff]   ;;  %v60_v46 = vld [vmem:[%s4439_s0 + $0x168] sm:$0xff]  ;;  %3077 = vmatprep.subr.bf16.mxu1 %v3368_v43  ;;  %v3370_v48 = vld [vmem:[%s4438_s1 + $0x18] sm:$0xff]   ;;  %v100_v50 = vpack.c.bf16 %v58_v42, %v57_v41 }
   0xd   :  { %3078 = vmatpush3.bf16.msra.mxu1 %v3368_v43  ;;  %v33_v51 = vld [vmem:[%s4439_s0 + $0x90] sm:$0xff]  ;;  %v34_v52 = vld [vmem:[%s4439_s0 + $0x98] sm:$0xff]  ;;  %v101_v53 = vpack.c.bf16 %v60_v46, %v59_v44  ;;  %v3371_v54 = vld [vmem:[%s4438_s1 + $0x20] sm:$0xff]  }
   0xe   :  { %3018 = vmatmul.mubr.msk.bf16.gmra.mrb[4].mxu0 %vm124_vm0, %v82_v14  ;;  %3079 = vmatprep.subr.bf16.mxu1 %v3369_v45  ;;  %v35_v55 = vld [vmem:[%s4439_s0 + $0xa0] sm:$0xff]  ;;  %v36_v56 = vld [vmem:[%s4439_s0 + $0xa8] sm:$0xff]  ;;  %v61_v57 = vld [vmem:[%s4439_s0 + $0x170] sm:$0xff]  ;;  %v88_v59 = vpack.c.bf16 %v34_v52, %v33_v51 }
   0xf   :  { %3021 = vmatprep.mubr.msk.bf16.mxu0 %vm124_vm0, %v83_v15  ;;  %v62_v58 = vld [vmem:[%s4439_s0 + $0x178] sm:$0xff]  ;;  %v63_v60 = vld [vmem:[%s4439_s0 + $0x180] sm:$0xff]  ;;  %v64_v61 = vld [vmem:[%s4439_s0 + $0x188] sm:$0xff]  ;;  %v89_v62 = vpack.c.bf16 %v36_v56, %v35_v55 }
  0x10   :  { %v102_v63 = vpack.c.bf16 %v62_v58, %v61_v57  ;;  %v103_v0 = vpack.c.bf16 %v64_v61, %v63_v60  ;;  %v37_v1 = vld [vmem:[%s4439_s0 + $0xb0] sm:$0xff]  ;;  %v38_v2 = vld [vmem:[%s4439_s0 + $0xb8] sm:$0xff]  ;;  %v39_v3 = vld [vmem:[%s4439_s0 + $0xc0] sm:$0xff] }
  0x11   :  { %3050 = vmatmul.mubr.msk.bf16.gmra.mrb[4].mxu1 %vm124_vm0, %v98_v35  ;;  %v40_v4 = vld [vmem:[%s4439_s0 + $0xc8] sm:$0xff]  ;;  %v65_v5 = vld [vmem:[%s4439_s0 + $0x190] sm:$0xff]  ;;  %v66_v6 = vld [vmem:[%s4439_s0 + $0x198] sm:$0xff]  ;;  %v90_v7 = vpack.c.bf16 %v38_v2, %v37_v1 }
  0x12   :  { %3053 = vmatprep.mubr.msk.bf16.mxu1 %vm124_vm0, %v99_v38  ;;  %3080 = vmatpush3.bf16.msra.mxu1 %v3369_v45  ;;  %v67_v8 = vld [vmem:[%s4439_s0 + $0x1a0] sm:$0xff]  ;;  %v68_v9 = vld [vmem:[%s4439_s0 + $0x1a8] sm:$0xff]  ;;  %v91_v10 = vpack.c.bf16 %v40_v4, %v39_v3  ;;  %v104_v11 = vpack.c.bf16 %v66_v6, %v65_v5  ;;  %v41_v13 = vld [vmem:[%s4439_s0 + $0xd0] sm:$0xff] }
  0x13   :  { %3081 = vmatprep.subr.bf16.mxu1 %v3370_v48  ;;  %v105_v12 = vpack.c.bf16 %v68_v9, %v67_v8  ;;  %v42_v14 = vld [vmem:[%s4439_s0 + $0xd8] sm:$0xff]  ;;  %v43_v15 = vld [vmem:[%s4439_s0 + $0xe0] sm:$0xff]  ;;  %v44_v16 = vld [vmem:[%s4439_s0 + $0xe8] sm:$0xff] }
  0x14   :  { %v69_v17 = vld [vmem:[%s4439_s0 + $0x1b0] sm:$0xff]  ;;  %v70_v18 = vld [vmem:[%s4439_s0 + $0x1b8] sm:$0xff]  ;;  %v92_v19 = vpack.c.bf16 %v42_v14, %v41_v13  ;;  %v71_v20 = vld [vmem:[%s4439_s0 + $0x1c0] sm:$0xff]  ;;  %v93_v22 = vpack.c.bf16 %v44_v16, %v43_v15 }
  0x15   :  { %v72_v21 = vld [vmem:[%s4439_s0 + $0x1c8] sm:$0xff]  ;;  %v106_v23 = vpack.c.bf16 %v70_v18, %v69_v17  ;;  %v45_v25 = vld [vmem:[%s4439_s0 + $0xf0] sm:$0xff]  ;;  %v46_v26 = vld [vmem:[%s4439_s0 + $0xf8] sm:$0xff] }
  0x16   :  { %3022 = vmatmul.mubr.msk.bf16.gmra.mrb[8].mxu0 %vm124_vm0, %v84_v31  ;;  %3082 = vmatpush3.bf16.msra.mxu1 %v3370_v48  ;;  %v107_v24 = vpack.c.bf16 %v72_v21, %v71_v20  ;;  %v73_v27 = vld [vmem:[%s4439_s0 + $0x1d0] sm:$0xff]  ;;  %v74_v28 = vld [vmem:[%s4439_s0 + $0x1d8] sm:$0xff]  ;;  %v94_v29 = vpack.c.bf16 %v46_v26, %v45_v25  ;;  %v75_v30 = vld [vmem:[%s4439_s0 + $0x1e0] sm:$0xff] }
  0x17   :  { %3025 = vmatprep.mubr.msk.bf16.mxu0 %vm124_vm0, %v85_v34  ;;  %3083 = vmatprep.subr.bf16.mxu1 %v3371_v54  ;;  %v76_v31 = vld [vmem:[%s4439_s0 + $0x1e8] sm:$0xff]  ;;  %v108_v32 = vpack.c.bf16 %v74_v28, %v73_v27  ;;  %v77_v34 = vld [vmem:[%s4439_s0 + $0x1f0] sm:$0xff]  ;;  %v78_v35 = vld [vmem:[%s4439_s0 + $0x1f8] sm:$0xff] }
  0x18   :  { %v109_v33 = vpack.c.bf16 %v76_v31, %v75_v30  ;;  %v110_v36 = vpack.c.bf16 %v78_v35, %v77_v34  ;;  %v3646_v37 = vld [vmem:[%s4440_s2] ss:$0 sm:$0xff]  ;;  %v3372_v45 = vld [vmem:[%s4438_s1 + $0x28] sm:$0xff]   ;;  %v3373_v46 = vld [vmem:[%s4438_s1 + $0x30] sm:$0xff]  }
  0x19   :  { %3054 = vmatmul.mubr.msk.bf16.gmra.mrb[8].mxu1 %vm124_vm0, %v100_v50  ;;  %3149 = vmatprep.subr.bf16.mxu0 %v3372_v45  ;;  %v3375_v1 = vld [vmem:[%s4438_s1 + $0x40] sm:$0xff]  }
  0x1a   :  { %3057 = vmatprep.mubr.msk.bf16.mxu1 %vm124_vm0, %v101_v53  ;;  %3084 = vmatpush3.bf16.msra.mxu1 %v3371_v54  ;;  %v3374_v53 = vld [vmem:[%s4438_s1 + $0x38] sm:$0xff]  }
  0x1b   :  { %3150 = vmatpush3.bf16.msra.mxu0 %v3372_v45 }
  0x1c   :  { %3151 = vmatprep.subr.bf16.mxu0 %v3373_v46 }
  0x1e   :  { %3026 = vmatmul.mubr.msk.bf16.gmra.mrb[12].mxu0 %vm124_vm0, %v86_v47 }
  0x1f   :  { %3029 = vmatprep.mubr.msk.bf16.mxu0 %vm124_vm0, %v87_v49  ;;  %3152 = vmatpush3.bf16.msra.mxu0 %v3373_v46 }
  0x20   :  { %3153 = vmatprep.subr.bf16.mxu0 %v3374_v53 }
  0x21   :  { %3058 = vmatmul.mubr.msk.bf16.gmra.mrb[12].mxu1 %vm124_vm0, %v102_v63 }
  0x22   :  { %3061 = vmatprep.mubr.msk.bf16.mxu1 %vm124_vm0, %v103_v0 }
  0x23   :  { %3154 = vmatpush3.bf16.msra.mxu0 %v3374_v53 }
  0x24   :  { %3155 = vmatprep.subr.bf16.mxu0 %v3375_v1 }
  0x26   :  { %3030 = vmatmul.mubr.msk.bf16.gmra.mrb[16].mxu0 %vm124_vm0, %v88_v59 }
  0x27   :  { %3033 = vmatprep.mubr.msk.bf16.mxu0 %vm124_vm0, %v89_v62  ;;  %3156 = vmatpush3.bf16.msra.mxu0 %v3375_v1 }
  0x29   :  { %3062 = vmatmul.mubr.msk.bf16.gmra.mrb[16].mxu1 %vm124_vm0, %v104_v11 }
  0x2a   :  { %3065 = vmatprep.mubr.msk.bf16.mxu1 %vm124_vm0, %v105_v12 }
  0x2e   :  { %3034 = vmatmul.mubr.msk.bf16.gmra.mrb[20].mxu0 %vm124_vm0, %v90_v7 }
  0x2f   :  { %3037 = vmatprep.mubr.msk.bf16.mxu0 %vm124_vm0, %v91_v10 }
  0x31   :  { %3066 = vmatmul.mubr.msk.bf16.gmra.mrb[20].mxu1 %vm124_vm0, %v106_v23 }
  0x32   :  { %3069 = vmatprep.mubr.msk.bf16.mxu1 %vm124_vm0, %v107_v24 }
  0x36   :  { %3038 = vmatmul.mubr.msk.bf16.gmra.mrb[24].mxu0 %vm124_vm0, %v92_v19 }
  0x37   :  { %3041 = vmatprep.mubr.msk.bf16.mxu0 %vm124_vm0, %v93_v22 }
  0x39   :  { %3070 = vmatmul.mubr.msk.bf16.gmra.mrb[24].mxu1 %vm124_vm0, %v108_v32 }
  0x3a   :  { %3073 = vmatprep.mubr.msk.bf16.mxu1 %vm124_vm0, %v109_v33 }
  0x3e   :  { %3042 = vmatmul.mubr.msk.bf16.gmra.mrb[28].mxu0 %vm124_vm0, %v94_v29 }
  0x41   :  { %3074 = vmatmul.mubr.msk.bf16.gmra.mrb[28].mxu1 %vm124_vm0, %v110_v36 }
  0xd9   :  { %v3015_v38 = vpop.f32.mrb[0].mxu0 }
  0xda   :  { %v264_v39 = vadd.f32 %v3015_v38, %v3646_v37  ;;  %v255_v40 = vpop.f32.mrb[1].mxu0 }
  0xdb   :  { %v256_v41 = vadd.f32 %v3646_v37, %v255_v40  ;;  %v3016_v42 = vpop.f32.mrb[2].mxu0 }
  0xdc   :  { %v267_v43 = vadd.f32 %v3016_v42, %v3646_v37  ;;  %v258_v44 = vpop.f32.mrb[3].mxu0  ;;  %v512_v48 = vmax.f32 %v264_v39, 0.0  ;;  %v3047_v60 = vpop.f32.mrb[0].mxu1 }
  0xdd   :  { %v259_v47 = vadd.f32 %v3646_v37, %v258_v44  ;;  %v510_v50 = vmax.f32 %v256_v41, 0.0  ;;  %v392_v63 = vadd.f32 %v3047_v60, %v3646_v37  ;;  %v383_v0 = vpop.f32.mrb[1].mxu1 }
  0xde   :  { %v513_v49 = vmax.f32 %v267_v43, 0.0  ;;  %v384_v3 = vadd.f32 %v3646_v37, %v383_v0  ;;  %v3048_v4 = vpop.f32.mrb[2].mxu1 }
  0xdf   :  { %v511_v51 = vmax.f32 %v259_v47, 0.0  ;;  %v544_v7 = vmax.f32 %v392_v63, 0.0  ;;  %v395_v8 = vadd.f32 %v3048_v4, %v3646_v37  ;;  %v386_v9 = vpop.f32.mrb[3].mxu1 }
  0xe0   :  { %v575_v52 = vpack.c.bf16 %v513_v49, %v512_v48  ;;  %v542_v12 = vmax.f32 %v384_v3, 0.0  ;;  %v387_v13 = vadd.f32 %v3646_v37, %v386_v9 }
  0xe1   :  { %v574_v54 = vpack.c.bf16 %v511_v51, %v510_v50  ;;  %v3019_v55 = vpop.f32.mrb[4].mxu0  ;;  %v545_v15 = vmax.f32 %v395_v8, 0.0 }
  0xe2   :  { %v280_v56 = vadd.f32 %v3019_v55, %v3646_v37  ;;  %v271_v57 = vpop.f32.mrb[5].mxu0  ;;  %v543_v18 = vmax.f32 %v387_v13, 0.0 }
  0xe3   :  { %v272_v58 = vadd.f32 %v3646_v37, %v271_v57  ;;  %v3020_v59 = vpop.f32.mrb[6].mxu0  ;;  %3085 = vmatprep.mubr.msk.bf16.mxu1 %vm643_vm1, %v574_v54  ;;  %v3675_v21 = vpack.c.bf16 %v545_v15, %v544_v7 }
  0xe4   :  { %v283_v61 = vadd.f32 %v3020_v59, %v3646_v37  ;;  %v274_v62 = vpop.f32.mrb[7].mxu0  ;;  %3086 = vmatmul.mubr.msk.bf16.vlgmr.msra.gmra.mrb[32].mxu1 %vm643_vm1, %v575_v52  ;;  %v516_v5 = vmax.f32 %v280_v56, 0.0  ;;  %v3679_v24 = vpack.c.bf16 %v543_v18, %v542_v12  ;;  %v3051_v25 = vpop.f32.mrb[4].mxu1 }
  0xe5   :  { %v275_v2 = vadd.f32 %v3646_v37, %v274_v62  ;;  %v514_v10 = vmax.f32 %v272_v58, 0.0  ;;  %v408_v28 = vadd.f32 %v3051_v25, %v3646_v37  ;;  %v399_v29 = vpop.f32.mrb[5].mxu1 }
  0xe6   :  { %v517_v6 = vmax.f32 %v283_v61, 0.0  ;;  %v400_v31 = vadd.f32 %v3646_v37, %v399_v29  ;;  %v3052_v32 = vpop.f32.mrb[6].mxu1 }
  0xe7   :  { %v515_v11 = vmax.f32 %v275_v2, 0.0  ;;  %v548_v35 = vmax.f32 %v408_v28, 0.0  ;;  %v411_v36 = vadd.f32 %v3052_v32, %v3646_v37  ;;  %v402_v38 = vpop.f32.mrb[7].mxu1 }
  0xe8   :  { %v577_v14 = vpack.c.bf16 %v517_v6, %v516_v5  ;;  %v546_v41 = vmax.f32 %v400_v31, 0.0  ;;  %v403_v42 = vadd.f32 %v3646_v37, %v402_v38 }
  0xe9   :  { %v576_v16 = vpack.c.bf16 %v515_v11, %v514_v10  ;;  %v3023_v17 = vpop.f32.mrb[8].mxu0  ;;  %v549_v44 = vmax.f32 %v411_v36, 0.0 }
  0xea   :  { %v296_v19 = vadd.f32 %v3023_v17, %v3646_v37  ;;  %v287_v20 = vpop.f32.mrb[9].mxu0  ;;  %v547_v47 = vmax.f32 %v403_v42, 0.0 }
  0xeb   :  { %v288_v22 = vadd.f32 %v3646_v37, %v287_v20  ;;  %v3024_v23 = vpop.f32.mrb[10].mxu0  ;;  %3089 = vmatprep.mubr.msk.bf16.mxu1 %vm643_vm1, %v576_v16  ;;  %v3689_v50 = vpack.c.bf16 %v549_v44, %v548_v35 }
  0xec   :  { %v299_v26 = vadd.f32 %v3024_v23, %v3646_v37  ;;  %v290_v27 = vpop.f32.mrb[11].mxu0  ;;  %3090 = vmatmul.mubr.msk.bf16.gmra.mrb[36].mxu1 %vm643_vm1, %v577_v14  ;;  %v520_v33 = vmax.f32 %v296_v19, 0.0  ;;  %v3693_v53 = vpack.c.bf16 %v547_v47, %v546_v41  ;;  %v3055_v54 = vpop.f32.mrb[8].mxu1 }
  0xed   :  { %v291_v30 = vadd.f32 %v3646_v37, %v290_v27  ;;  %v518_v39 = vmax.f32 %v288_v22, 0.0  ;;  %v424_v57 = vadd.f32 %v3055_v54, %v3646_v37  ;;  %v415_v58 = vpop.f32.mrb[9].mxu1 }
  0xee   :  { %v521_v34 = vmax.f32 %v299_v26, 0.0  ;;  %v416_v60 = vadd.f32 %v3646_v37, %v415_v58  ;;  %v3056_v61 = vpop.f32.mrb[10].mxu1 }
  0xef   :  { %v519_v40 = vmax.f32 %v291_v30, 0.0  ;;  %v552_v0 = vmax.f32 %v424_v57, 0.0  ;;  %v427_v1 = vadd.f32 %v3056_v61, %v3646_v37  ;;  %v418_v2 = vpop.f32.mrb[11].mxu1 }
  0xf0   :  { %v579_v43 = vpack.c.bf16 %v521_v34, %v520_v33  ;;  %v550_v5 = vmax.f32 %v416_v60, 0.0  ;;  %v419_v6 = vadd.f32 %v3646_v37, %v418_v2 }
  0xf1   :  { %v578_v45 = vpack.c.bf16 %v519_v40, %v518_v39  ;;  %v3027_v46 = vpop.f32.mrb[12].mxu0  ;;  %v553_v8 = vmax.f32 %v427_v1, 0.0 }
  0xf2   :  { %v312_v48 = vadd.f32 %v3027_v46, %v3646_v37  ;;  %v303_v49 = vpop.f32.mrb[13].mxu0  ;;  %v551_v11 = vmax.f32 %v419_v6, 0.0 }
  0xf3   :  { %v304_v51 = vadd.f32 %v3646_v37, %v303_v49  ;;  %v3028_v52 = vpop.f32.mrb[14].mxu0  ;;  %3093 = vmatprep.mubr.msk.bf16.mxu1 %vm643_vm1, %v578_v45  ;;  %v3703_v14 = vpack.c.bf16 %v553_v8, %v552_v0 }
  0xf4   :  { %v315_v55 = vadd.f32 %v3028_v52, %v3646_v37  ;;  %v306_v56 = vpop.f32.mrb[15].mxu0  ;;  %3094 = vmatmul.mubr.msk.bf16.gmra.mrb[40].mxu1 %vm643_vm1, %v579_v43  ;;  %v524_v62 = vmax.f32 %v312_v48, 0.0  ;;  %v3707_v17 = vpack.c.bf16 %v551_v11, %v550_v5  ;;  %v3059_v18 = vpop.f32.mrb[12].mxu1 }
  0xf5   :  { %v307_v59 = vadd.f32 %v3646_v37, %v306_v56  ;;  %v522_v3 = vmax.f32 %v304_v51, 0.0  ;;  %v440_v22 = vadd.f32 %v3059_v18, %v3646_v37  ;;  %v431_v23 = vpop.f32.mrb[13].mxu1 }
  0xf6   :  { %v525_v63 = vmax.f32 %v315_v55, 0.0  ;;  %v432_v26 = vadd.f32 %v3646_v37, %v431_v23  ;;  %v3060_v27 = vpop.f32.mrb[14].mxu1 }
  0xf7   :  { %v523_v4 = vmax.f32 %v307_v59, 0.0  ;;  %v556_v30 = vmax.f32 %v440_v22, 0.0  ;;  %v443_v31 = vadd.f32 %v3060_v27, %v3646_v37  ;;  %v434_v32 = vpop.f32.mrb[15].mxu1 }
  0xf8   :  { %v581_v7 = vpack.c.bf16 %v525_v63, %v524_v62  ;;  %v554_v35 = vmax.f32 %v432_v26, 0.0  ;;  %v435_v36 = vadd.f32 %v3646_v37, %v434_v32 }
  0xf9   :  { %v580_v9 = vpack.c.bf16 %v523_v4, %v522_v3  ;;  %v3031_v10 = vpop.f32.mrb[16].mxu0  ;;  %v557_v39 = vmax.f32 %v443_v31, 0.0 }
  0xfa   :  { %v328_v12 = vadd.f32 %v3031_v10, %v3646_v37  ;;  %v319_v13 = vpop.f32.mrb[17].mxu0  ;;  %v555_v42 = vmax.f32 %v435_v36, 0.0 }
  0xfb   :  { %v320_v15 = vadd.f32 %v3646_v37, %v319_v13  ;;  %v3032_v16 = vpop.f32.mrb[18].mxu0  ;;  %3097 = vmatprep.mubr.msk.bf16.mxu1 %vm643_vm1, %v580_v9  ;;  %v3717_v45 = vpack.c.bf16 %v557_v39, %v556_v30 }
  0xfc   :  { %v331_v19 = vadd.f32 %v3032_v16, %v3646_v37  ;;  %v322_v20 = vpop.f32.mrb[19].mxu0  ;;  %3098 = vmatmul.mubr.msk.bf16.gmra.mrb[44].mxu1 %vm643_vm1, %v581_v7  ;;  %v528_v28 = vmax.f32 %v328_v12, 0.0  ;;  %v3721_v48 = vpack.c.bf16 %v555_v42, %v554_v35  ;;  %v3063_v49 = vpop.f32.mrb[16].mxu1 }
  0xfd   :  { %v323_v25 = vadd.f32 %v3646_v37, %v322_v20  ;;  %v526_v33 = vmax.f32 %v320_v15, 0.0  ;;  %v456_v54 = vadd.f32 %v3063_v49, %v3646_v37  ;;  %v447_v55 = vpop.f32.mrb[17].mxu1 }
  0xfe   :  { %v529_v29 = vmax.f32 %v331_v19, 0.0  ;;  %v448_v57 = vadd.f32 %v3646_v37, %v447_v55  ;;  %v3064_v58 = vpop.f32.mrb[18].mxu1 }
  0xff   :  { %v527_v34 = vmax.f32 %v323_v25, 0.0  ;;  %v560_v61 = vmax.f32 %v456_v54, 0.0  ;;  %v459_v62 = vadd.f32 %v3064_v58, %v3646_v37  ;;  %v450_v63 = vpop.f32.mrb[19].mxu1 }
 0x100   :  { %v583_v38 = vpack.c.bf16 %v529_v29, %v528_v28  ;;  %v558_v2 = vmax.f32 %v448_v57, 0.0  ;;  %v451_v3 = vadd.f32 %v3646_v37, %v450_v63 }
 0x101   :  { %v582_v40 = vpack.c.bf16 %v527_v34, %v526_v33  ;;  %v3035_v41 = vpop.f32.mrb[20].mxu0  ;;  %v561_v5 = vmax.f32 %v459_v62, 0.0 }
 0x102   :  { %v344_v43 = vadd.f32 %v3035_v41, %v3646_v37  ;;  %v335_v44 = vpop.f32.mrb[21].mxu0  ;;  %v559_v8 = vmax.f32 %v451_v3, 0.0 }
 0x103   :  { %v336_v46 = vadd.f32 %v3646_v37, %v335_v44  ;;  %v3036_v47 = vpop.f32.mrb[22].mxu0  ;;  %3101 = vmatprep.mubr.msk.bf16.mxu1 %vm643_vm1, %v582_v40  ;;  %v3731_v11 = vpack.c.bf16 %v561_v5, %v560_v61 }
 0x104   :  { %v347_v51 = vadd.f32 %v3036_v47, %v3646_v37  ;;  %v338_v52 = vpop.f32.mrb[23].mxu0  ;;  %3102 = vmatmul.mubr.msk.bf16.gmra.mrb[48].mxu1 %vm643_vm1, %v583_v38  ;;  %v532_v59 = vmax.f32 %v344_v43, 0.0  ;;  %v3735_v15 = vpack.c.bf16 %v559_v8, %v558_v2  ;;  %v3067_v16 = vpop.f32.mrb[20].mxu1 }
 0x105   :  { %v339_v56 = vadd.f32 %v3646_v37, %v338_v52  ;;  %v530_v0 = vmax.f32 %v336_v46, 0.0  ;;  %v472_v20 = vadd.f32 %v3067_v16, %v3646_v37  ;;  %v463_v22 = vpop.f32.mrb[21].mxu1 }
 0x106   :  { %v533_v60 = vmax.f32 %v347_v51, 0.0  ;;  %v464_v25 = vadd.f32 %v3646_v37, %v463_v22  ;;  %v3068_v26 = vpop.f32.mrb[22].mxu1 }
 0x107   :  { %v531_v1 = vmax.f32 %v339_v56, 0.0  ;;  %v564_v29 = vmax.f32 %v472_v20, 0.0  ;;  %v475_v30 = vadd.f32 %v3068_v26, %v3646_v37  ;;  %v466_v31 = vpop.f32.mrb[23].mxu1 }
 0x108   :  { %v585_v4 = vpack.c.bf16 %v533_v60, %v532_v59  ;;  %v562_v34 = vmax.f32 %v464_v25, 0.0  ;;  %v467_v35 = vadd.f32 %v3646_v37, %v466_v31 }
 0x109   :  { %v584_v6 = vpack.c.bf16 %v531_v1, %v530_v0  ;;  %v3039_v7 = vpop.f32.mrb[24].mxu0  ;;  %v565_v38 = vmax.f32 %v475_v30, 0.0 }
 0x10a   :  { %v360_v9 = vadd.f32 %v3039_v7, %v3646_v37  ;;  %v351_v10 = vpop.f32.mrb[25].mxu0  ;;  %v563_v41 = vmax.f32 %v467_v35, 0.0 }
 0x10b   :  { %v352_v12 = vadd.f32 %v3646_v37, %v351_v10  ;;  %v3040_v13 = vpop.f32.mrb[26].mxu0  ;;  %3105 = vmatprep.mubr.msk.bf16.mxu1 %vm643_vm1, %v584_v6  ;;  %v601_v44 = vpack.c.bf16 %v565_v38, %v564_v29  ;;  %v3379_v38 = vld [vmem:[%s4438_s1 + $0x60] sm:$0xff]  }
 0x10c   :  { %v363_v18 = vadd.f32 %v3040_v13, %v3646_v37  ;;  %v354_v19 = vpop.f32.mrb[27].mxu0  ;;  %3106 = vmatmul.mubr.msk.bf16.gmra.mrb[52].mxu1 %vm643_vm1, %v585_v4  ;;  %v536_v27 = vmax.f32 %v360_v9, 0.0  ;;  %v600_v49 = vpack.c.bf16 %v563_v41, %v562_v34  ;;  %v3071_v51 = vpop.f32.mrb[24].mxu1 }
 0x10d   :  { %v355_v23 = vadd.f32 %v3646_v37, %v354_v19  ;;  %v534_v32 = vmax.f32 %v352_v12, 0.0  ;;  %v488_v55 = vadd.f32 %v3071_v51, %v3646_v37  ;;  %v479_v56 = vpop.f32.mrb[25].mxu1 }
 0x10e   :  { %v537_v28 = vmax.f32 %v363_v18, 0.0  ;;  %v480_v58 = vadd.f32 %v3646_v37, %v479_v56  ;;  %v3072_v59 = vpop.f32.mrb[26].mxu1 }
 0x10f   :  { %v535_v33 = vmax.f32 %v355_v23, 0.0  ;;  %v568_v62 = vmax.f32 %v488_v55, 0.0  ;;  %v491_v63 = vadd.f32 %v3072_v59, %v3646_v37  ;;  %v482_v0 = vpop.f32.mrb[27].mxu1 }
 0x110   :  { %v587_v36 = vpack.c.bf16 %v537_v28, %v536_v27  ;;  %v566_v3 = vmax.f32 %v480_v58, 0.0  ;;  %v483_v4 = vadd.f32 %v3646_v37, %v482_v0 }
 0x111   :  { %v586_v39 = vpack.c.bf16 %v535_v33, %v534_v32  ;;  %v3043_v40 = vpop.f32.mrb[28].mxu0  ;;  %v569_v6 = vmax.f32 %v491_v63, 0.0 }
 0x112   :  { %v376_v42 = vadd.f32 %v3043_v40, %v3646_v37  ;;  %v367_v43 = vpop.f32.mrb[29].mxu0  ;;  %v567_v8 = vmax.f32 %v483_v4, 0.0 }
 0x113   :  { %v368_v46 = vadd.f32 %v3646_v37, %v367_v43  ;;  %v3044_v47 = vpop.f32.mrb[30].mxu0  ;;  %3109 = vmatprep.mubr.msk.bf16.mxu1 %vm643_vm1, %v586_v39  ;;  %v603_v9 = vpack.c.bf16 %v569_v6, %v568_v62 }
 0x114   :  { %v379_v52 = vadd.f32 %v3044_v47, %v3646_v37  ;;  %v370_v54 = vpop.f32.mrb[31].mxu0  ;;  %3110 = vmatmul.mubr.msk.bf16.gmra.mrb[56].mxu1 %vm643_vm1, %v587_v36  ;;  %v540_v60 = vmax.f32 %v376_v42, 0.0  ;;  %v602_v10 = vpack.c.bf16 %v567_v8, %v566_v3  ;;  %v3075_v12 = vpop.f32.mrb[28].mxu1 }
 0x115   :  { %v371_v57 = vadd.f32 %v3646_v37, %v370_v54  ;;  %v538_v1 = vmax.f32 %v368_v46, 0.0  ;;  %v504_v13 = vadd.f32 %v3075_v12, %v3646_v37  ;;  %v495_v16 = vpop.f32.mrb[29].mxu1 }
 0x116   :  { %v541_v61 = vmax.f32 %v379_v52, 0.0  ;;  %v496_v18 = vadd.f32 %v3646_v37, %v495_v16  ;;  %v3076_v19 = vpop.f32.mrb[30].mxu1 }
 0x117   :  { %v539_v2 = vmax.f32 %v371_v57, 0.0  ;;  %v572_v20 = vmax.f32 %v504_v13, 0.0  ;;  %v507_v22 = vadd.f32 %v3076_v19, %v3646_v37  ;;  %v498_v23 = vpop.f32.mrb[31].mxu1 }
 0x118   :  { %v589_v5 = vpack.c.bf16 %v541_v61, %v540_v60  ;;  %v570_v25 = vmax.f32 %v496_v18, 0.0  ;;  %v499_v26 = vadd.f32 %v3646_v37, %v498_v23  ;;  %v3376_v37 = vld [vmem:[%s4438_s1 + $0x48] sm:$0xff]  }
 0x119   :  { %v588_v7 = vpack.c.bf16 %v539_v2, %v538_v1  ;;  %v573_v27 = vmax.f32 %v507_v22, 0.0  ;;  %3221 = vmatprep.subr.bf16.mxu1 %v3376_v37 }
 0x11a   :  { %v571_v28 = vmax.f32 %v499_v26, 0.0  ;;  %3222 = vmatpush3.bf16.msra.mxu1 %v3376_v37 }
 0x11b   :  { %3113 = vmatprep.mubr.msk.bf16.mxu1 %vm643_vm1, %v588_v7  ;;  %v605_v29 = vpack.c.bf16 %v573_v27, %v572_v20 }
 0x11c   :  { %3114 = vmatmul.mubr.msk.bf16.gmra.mrb[60].mxu1 %vm643_vm1, %v589_v5  ;;  %v604_v30 = vpack.c.bf16 %v571_v28, %v570_v25 }
 0x11d   :  { %3117 = vmatprep.mubr.msk.bf16.mxu1 %vm643_vm1, %v3679_v24 }
 0x124   :  { %3118 = vmatmul.mubr.msk.bf16.gmra.mrb[64].mxu1 %vm643_vm1, %v3675_v21  ;;  %v3792_v21 = vld [vmem:[%s4440_s2 + $0x1] ss:$0 sm:$0xff] }
 0x125   :  { %3121 = vmatprep.mubr.msk.bf16.mxu1 %vm643_vm1, %v3693_v53 }
 0x12c   :  { %3122 = vmatmul.mubr.msk.bf16.gmra.mrb[68].mxu1 %vm643_vm1, %v3689_v50 }
 0x12d   :  { %3125 = vmatprep.mubr.msk.bf16.mxu1 %vm643_vm1, %v3707_v17 }
 0x134   :  { %3126 = vmatmul.mubr.msk.bf16.gmra.mrb[72].mxu1 %vm643_vm1, %v3703_v14 }
 0x135   :  { %3129 = vmatprep.mubr.msk.bf16.mxu1 %vm643_vm1, %v3721_v48 }
 0x13c   :  { %3130 = vmatmul.mubr.msk.bf16.gmra.mrb[76].mxu1 %vm643_vm1, %v3717_v45 }
 0x13d   :  { %3133 = vmatprep.mubr.msk.bf16.mxu1 %vm643_vm1, %v3735_v15  ;;  %v3378_v15 = vld [vmem:[%s4438_s1 + $0x58] sm:$0xff]  }
 0x144   :  { %3134 = vmatmul.mubr.msk.bf16.gmra.mrb[80].mxu1 %vm643_vm1, %v3731_v11  ;;  %v3377_v11 = vld [vmem:[%s4438_s1 + $0x50] sm:$0xff]  }
 0x145   :  { %3137 = vmatprep.mubr.msk.bf16.mxu1 %vm643_vm1, %v600_v49  ;;  %3223 = vmatprep.subr.bf16.mxu1 %v3377_v11 }
 0x146   :  { %3224 = vmatpush3.bf16.msra.mxu1 %v3377_v11 }
 0x147   :  { %3225 = vmatprep.subr.bf16.mxu1 %v3378_v15 }
 0x14a   :  { %3226 = vmatpush3.bf16.msra.mxu1 %v3378_v15 }
 0x14b   :  { %3227 = vmatprep.subr.bf16.mxu1 %v3379_v38 }
 0x14c   :  { %3138 = vmatmul.mubr.msk.bf16.gmra.mrb[84].mxu1 %vm643_vm1, %v601_v44 }
 0x14d   :  { %3141 = vmatprep.mubr.msk.bf16.mxu1 %vm643_vm1, %v602_v10 }
 0x14e   :  { %3228 = vmatpush3.bf16.msra.mxu1 %v3379_v38 }
 0x154   :  { %3142 = vmatmul.mubr.msk.bf16.gmra.mrb[88].mxu1 %vm643_vm1, %v603_v9 }
 0x155   :  { %3145 = vmatprep.mubr.msk.bf16.mxu1 %vm643_vm1, %v604_v30 }
 0x15c   :  { %3146 = vmatmul.mubr.msk.bf16.gmra.mrb[92].mxu1 %vm643_vm1, %v605_v29 }
 0x1b7   :  { %v3087_v24 = vpop.f32.mrb[32].mxu1 }
 0x1b8   :  { %v783_v50 = vadd.f32 %v3087_v24, %v3792_v21  ;;  %v774_v53 = vpop.f32.mrb[33].mxu1 }
 0x1b9   :  { %v775_v14 = vadd.f32 %v3792_v21, %v774_v53  ;;  %v3088_v17 = vpop.f32.mrb[34].mxu1 }
 0x1ba   :  { %v786_v45 = vadd.f32 %v3088_v17, %v3792_v21  ;;  %v777_v48 = vpop.f32.mrb[35].mxu1  ;;  %v1031_v32 = vmax.f32 %v783_v50, 0.0 }
 0x1bb   :  { %v778_v31 = vadd.f32 %v3792_v21, %v777_v48  ;;  %v1029_v34 = vmax.f32 %v775_v14, 0.0 }
 0x1bc   :  { %v1032_v33 = vmax.f32 %v786_v45, 0.0 }
 0x1bd   :  { %v1030_v35 = vmax.f32 %v778_v31, 0.0 }
 0x1be   :  { %v1094_v36 = vpack.c.bf16 %v1032_v33, %v1031_v32 }
 0x1bf   :  { %v1093_v39 = vpack.c.bf16 %v1030_v35, %v1029_v34  ;;  %v3091_v40 = vpop.f32.mrb[36].mxu1 }
 0x1c0   :  { %v799_v41 = vadd.f32 %v3091_v40, %v3792_v21  ;;  %v790_v42 = vpop.f32.mrb[37].mxu1 }
 0x1c1   :  { %v791_v43 = vadd.f32 %v3792_v21, %v790_v42  ;;  %v3092_v44 = vpop.f32.mrb[38].mxu1  ;;  %3157 = vmatprep.mubr.msk.bf16.mxu0 %vm643_vm1, %v1093_v39 }
 0x1c2   :  { %v802_v46 = vadd.f32 %v3092_v44, %v3792_v21  ;;  %v793_v47 = vpop.f32.mrb[39].mxu1  ;;  %3158 = vmatmul.mubr.msk.bf16.vlgmr.msra.gmra.mrb[32].mxu0 %vm643_vm1, %v1094_v36  ;;  %v1035_v51 = vmax.f32 %v799_v41, 0.0 }
 0x1c3   :  { %v794_v49 = vadd.f32 %v3792_v21, %v793_v47  ;;  %v1033_v54 = vmax.f32 %v791_v43, 0.0 }
 0x1c4   :  { %v1036_v52 = vmax.f32 %v802_v46, 0.0 }
 0x1c5   :  { %v1034_v55 = vmax.f32 %v794_v49, 0.0 }
 0x1c6   :  { %v1096_v56 = vpack.c.bf16 %v1036_v52, %v1035_v51 }
 0x1c7   :  { %v1095_v57 = vpack.c.bf16 %v1034_v55, %v1033_v54  ;;  %v3095_v58 = vpop.f32.mrb[40].mxu1 }
 0x1c8   :  { %v815_v59 = vadd.f32 %v3095_v58, %v3792_v21  ;;  %v806_v60 = vpop.f32.mrb[41].mxu1 }
 0x1c9   :  { %v807_v61 = vadd.f32 %v3792_v21, %v806_v60  ;;  %v3096_v62 = vpop.f32.mrb[42].mxu1  ;;  %3161 = vmatprep.mubr.msk.bf16.mxu0 %vm643_vm1, %v1095_v57 }
 0x1ca   :  { %v818_v63 = vadd.f32 %v3096_v62, %v3792_v21  ;;  %v809_v0 = vpop.f32.mrb[43].mxu1  ;;  %3162 = vmatmul.mubr.msk.bf16.gmra.mrb[36].mxu0 %vm643_vm1, %v1096_v56  ;;  %v1039_v2 = vmax.f32 %v815_v59, 0.0 }
 0x1cb   :  { %v810_v1 = vadd.f32 %v3792_v21, %v809_v0  ;;  %v1037_v4 = vmax.f32 %v807_v61, 0.0 }
 0x1cc   :  { %v1040_v3 = vmax.f32 %v818_v63, 0.0 }
 0x1cd   :  { %v1038_v5 = vmax.f32 %v810_v1, 0.0 }
 0x1ce   :  { %v1098_v6 = vpack.c.bf16 %v1040_v3, %v1039_v2 }
 0x1cf   :  { %v1097_v7 = vpack.c.bf16 %v1038_v5, %v1037_v4  ;;  %v3099_v8 = vpop.f32.mrb[44].mxu1 }
 0x1d0   :  { %v831_v9 = vadd.f32 %v3099_v8, %v3792_v21  ;;  %v822_v10 = vpop.f32.mrb[45].mxu1 }
 0x1d1   :  { %v823_v12 = vadd.f32 %v3792_v21, %v822_v10  ;;  %v3100_v13 = vpop.f32.mrb[46].mxu1  ;;  %3165 = vmatprep.mubr.msk.bf16.mxu0 %vm643_vm1, %v1097_v7 }
 0x1d2   :  { %v834_v16 = vadd.f32 %v3100_v13, %v3792_v21  ;;  %v825_v18 = vpop.f32.mrb[47].mxu1  ;;  %3166 = vmatmul.mubr.msk.bf16.gmra.mrb[40].mxu0 %vm643_vm1, %v1098_v6  ;;  %v1043_v20 = vmax.f32 %v831_v9, 0.0 }
 0x1d3   :  { %v826_v19 = vadd.f32 %v3792_v21, %v825_v18  ;;  %v1041_v23 = vmax.f32 %v823_v12, 0.0 }
 0x1d4   :  { %v1044_v22 = vmax.f32 %v834_v16, 0.0 }
 0x1d5   :  { %v1042_v25 = vmax.f32 %v826_v19, 0.0 }
 0x1d6   :  { %v1100_v26 = vpack.c.bf16 %v1044_v22, %v1043_v20 }
 0x1d7   :  { %v1099_v27 = vpack.c.bf16 %v1042_v25, %v1041_v23  ;;  %v3103_v28 = vpop.f32.mrb[48].mxu1 }
 0x1d8   :  { %v847_v29 = vadd.f32 %v3103_v28, %v3792_v21  ;;  %v838_v30 = vpop.f32.mrb[49].mxu1 }
 0x1d9   :  { %v839_v37 = vadd.f32 %v3792_v21, %v838_v30  ;;  %v3104_v24 = vpop.f32.mrb[50].mxu1  ;;  %3169 = vmatprep.mubr.msk.bf16.mxu0 %vm643_vm1, %v1099_v27 }
 0x1da   :  { %v850_v50 = vadd.f32 %v3104_v24, %v3792_v21  ;;  %v841_v53 = vpop.f32.mrb[51].mxu1  ;;  %3170 = vmatmul.mubr.msk.bf16.gmra.mrb[44].mxu0 %vm643_vm1, %v1100_v26  ;;  %v1047_v17 = vmax.f32 %v847_v29, 0.0 }
 0x1db   :  { %v842_v14 = vadd.f32 %v3792_v21, %v841_v53  ;;  %v1045_v48 = vmax.f32 %v839_v37, 0.0 }
 0x1dc   :  { %v1048_v45 = vmax.f32 %v850_v50, 0.0 }
 0x1dd   :  { %v1046_v11 = vmax.f32 %v842_v14, 0.0 }
 0x1de   :  { %v1102_v15 = vpack.c.bf16 %v1048_v45, %v1047_v17 }
 0x1df   :  { %v1101_v31 = vpack.c.bf16 %v1046_v11, %v1045_v48  ;;  %v3107_v32 = vpop.f32.mrb[52].mxu1 }
 0x1e0   :  { %v863_v33 = vadd.f32 %v3107_v32, %v3792_v21  ;;  %v854_v34 = vpop.f32.mrb[53].mxu1 }
 0x1e1   :  { %v855_v35 = vadd.f32 %v3792_v21, %v854_v34  ;;  %v3108_v36 = vpop.f32.mrb[54].mxu1  ;;  %3173 = vmatprep.mubr.msk.bf16.mxu0 %vm643_vm1, %v1101_v31 }
 0x1e2   :  { %v866_v38 = vadd.f32 %v3108_v36, %v3792_v21  ;;  %v857_v39 = vpop.f32.mrb[55].mxu1  ;;  %3174 = vmatmul.mubr.msk.bf16.gmra.mrb[48].mxu0 %vm643_vm1, %v1102_v15  ;;  %v1051_v41 = vmax.f32 %v863_v33, 0.0 }
 0x1e3   :  { %v858_v40 = vadd.f32 %v3792_v21, %v857_v39  ;;  %v1049_v43 = vmax.f32 %v855_v35, 0.0 }
 0x1e4   :  { %v1052_v42 = vmax.f32 %v866_v38, 0.0 }
 0x1e5   :  { %v1050_v44 = vmax.f32 %v858_v40, 0.0 }
 0x1e6   :  { %v1104_v46 = vpack.c.bf16 %v1052_v42, %v1051_v41 }
 0x1e7   :  { %v1103_v47 = vpack.c.bf16 %v1050_v44, %v1049_v43  ;;  %v3111_v49 = vpop.f32.mrb[56].mxu1 }
 0x1e8   :  { %v879_v51 = vadd.f32 %v3111_v49, %v3792_v21  ;;  %v870_v52 = vpop.f32.mrb[57].mxu1 }
 0x1e9   :  { %v871_v54 = vadd.f32 %v3792_v21, %v870_v52  ;;  %v3112_v55 = vpop.f32.mrb[58].mxu1  ;;  %3177 = vmatprep.mubr.msk.bf16.mxu0 %vm643_vm1, %v1103_v47 }
 0x1ea   :  { %v882_v56 = vadd.f32 %v3112_v55, %v3792_v21  ;;  %v873_v57 = vpop.f32.mrb[59].mxu1  ;;  %3178 = vmatmul.mubr.msk.bf16.gmra.mrb[52].mxu0 %vm643_vm1, %v1104_v46  ;;  %v1055_v59 = vmax.f32 %v879_v51, 0.0 }
 0x1eb   :  { %v874_v58 = vadd.f32 %v3792_v21, %v873_v57  ;;  %v1053_v61 = vmax.f32 %v871_v54, 0.0 }
 0x1ec   :  { %v1056_v60 = vmax.f32 %v882_v56, 0.0 }
 0x1ed   :  { %v1054_v62 = vmax.f32 %v874_v58, 0.0 }
 0x1ee   :  { %v1106_v63 = vpack.c.bf16 %v1056_v60, %v1055_v59 }
 0x1ef   :  { %v1105_v0 = vpack.c.bf16 %v1054_v62, %v1053_v61  ;;  %v3115_v1 = vpop.f32.mrb[60].mxu1 }
 0x1f0   :  { %v895_v2 = vadd.f32 %v3115_v1, %v3792_v21  ;;  %v886_v3 = vpop.f32.mrb[61].mxu1 }
 0x1f1   :  { %v887_v4 = vadd.f32 %v3792_v21, %v886_v3  ;;  %v3116_v5 = vpop.f32.mrb[62].mxu1  ;;  %3181 = vmatprep.mubr.msk.bf16.mxu0 %vm643_vm1, %v1105_v0 }
 0x1f2   :  { %v898_v6 = vadd.f32 %v3116_v5, %v3792_v21  ;;  %v889_v7 = vpop.f32.mrb[63].mxu1  ;;  %3182 = vmatmul.mubr.msk.bf16.gmra.mrb[56].mxu0 %vm643_vm1, %v1106_v63  ;;  %v1059_v9 = vmax.f32 %v895_v2, 0.0 }
 0x1f3   :  { %v890_v8 = vadd.f32 %v3792_v21, %v889_v7  ;;  %v1057_v12 = vmax.f32 %v887_v4, 0.0 }
 0x1f4   :  { %v1060_v10 = vmax.f32 %v898_v6, 0.0 }
 0x1f5   :  { %v1058_v13 = vmax.f32 %v890_v8, 0.0 }
 0x1f6   :  { %v1108_v16 = vpack.c.bf16 %v1060_v10, %v1059_v9 }
 0x1f7   :  { %v1107_v18 = vpack.c.bf16 %v1058_v13, %v1057_v12  ;;  %v3119_v19 = vpop.f32.mrb[64].mxu1 }
 0x1f8   :  { %v911_v20 = vadd.f32 %v3119_v19, %v3792_v21  ;;  %v902_v22 = vpop.f32.mrb[65].mxu1 }
 0x1f9   :  { %v903_v23 = vadd.f32 %v3792_v21, %v902_v22  ;;  %v3120_v25 = vpop.f32.mrb[66].mxu1  ;;  %3185 = vmatprep.mubr.msk.bf16.mxu0 %vm643_vm1, %v1107_v18 }
 0x1fa   :  { %v914_v26 = vadd.f32 %v3120_v25, %v3792_v21  ;;  %v905_v27 = vpop.f32.mrb[67].mxu1  ;;  %3186 = vmatmul.mubr.msk.bf16.gmra.mrb[60].mxu0 %vm643_vm1, %v1108_v16  ;;  %v1063_v29 = vmax.f32 %v911_v20, 0.0 }
 0x1fb   :  { %v906_v28 = vadd.f32 %v3792_v21, %v905_v27  ;;  %v1061_v37 = vmax.f32 %v903_v23, 0.0 }
 0x1fc   :  { %v1064_v30 = vmax.f32 %v914_v26, 0.0 }
 0x1fd   :  { %v1062_v24 = vmax.f32 %v906_v28, 0.0 }
 0x1fe   :  { %v1110_v50 = vpack.c.bf16 %v1064_v30, %v1063_v29 }
 0x1ff   :  { %v1109_v53 = vpack.c.bf16 %v1062_v24, %v1061_v37  ;;  %v3123_v14 = vpop.f32.mrb[68].mxu1 }
 0x200   :  { %v927_v17 = vadd.f32 %v3123_v14, %v3792_v21  ;;  %v918_v45 = vpop.f32.mrb[69].mxu1 }
 0x201   :  { %v919_v48 = vadd.f32 %v3792_v21, %v918_v45  ;;  %v3124_v11 = vpop.f32.mrb[70].mxu1  ;;  %3189 = vmatprep.mubr.msk.bf16.mxu0 %vm643_vm1, %v1109_v53 }
 0x202   :  { %v930_v15 = vadd.f32 %v3124_v11, %v3792_v21  ;;  %v921_v31 = vpop.f32.mrb[71].mxu1  ;;  %3190 = vmatmul.mubr.msk.bf16.gmra.mrb[64].mxu0 %vm643_vm1, %v1110_v50  ;;  %v1067_v33 = vmax.f32 %v927_v17, 0.0 }
 0x203   :  { %v922_v32 = vadd.f32 %v3792_v21, %v921_v31  ;;  %v1065_v35 = vmax.f32 %v919_v48, 0.0 }
 0x204   :  { %v1068_v34 = vmax.f32 %v930_v15, 0.0 }
 0x205   :  { %v1066_v36 = vmax.f32 %v922_v32, 0.0 }
 0x206   :  { %v1112_v38 = vpack.c.bf16 %v1068_v34, %v1067_v33 }
 0x207   :  { %v1111_v39 = vpack.c.bf16 %v1066_v36, %v1065_v35  ;;  %v3127_v40 = vpop.f32.mrb[72].mxu1 }
 0x208   :  { %v943_v41 = vadd.f32 %v3127_v40, %v3792_v21  ;;  %v934_v42 = vpop.f32.mrb[73].mxu1 }
 0x209   :  { %v935_v43 = vadd.f32 %v3792_v21, %v934_v42  ;;  %v3128_v44 = vpop.f32.mrb[74].mxu1  ;;  %3193 = vmatprep.mubr.msk.bf16.mxu0 %vm643_vm1, %v1111_v39 }
 0x20a   :  { %v946_v46 = vadd.f32 %v3128_v44, %v3792_v21  ;;  %v937_v47 = vpop.f32.mrb[75].mxu1  ;;  %3194 = vmatmul.mubr.msk.bf16.gmra.mrb[68].mxu0 %vm643_vm1, %v1112_v38  ;;  %v1071_v51 = vmax.f32 %v943_v41, 0.0 }
 0x20b   :  { %v938_v49 = vadd.f32 %v3792_v21, %v937_v47  ;;  %v1069_v54 = vmax.f32 %v935_v43, 0.0 }
 0x20c   :  { %v1072_v52 = vmax.f32 %v946_v46, 0.0 }
 0x20d   :  { %v1070_v55 = vmax.f32 %v938_v49, 0.0 }
 0x20e   :  { %v1114_v56 = vpack.c.bf16 %v1072_v52, %v1071_v51 }
 0x20f   :  { %v1113_v57 = vpack.c.bf16 %v1070_v55, %v1069_v54  ;;  %v3131_v58 = vpop.f32.mrb[76].mxu1 }
 0x210   :  { %v959_v59 = vadd.f32 %v3131_v58, %v3792_v21  ;;  %v950_v60 = vpop.f32.mrb[77].mxu1 }
 0x211   :  { %v951_v61 = vadd.f32 %v3792_v21, %v950_v60  ;;  %v3132_v62 = vpop.f32.mrb[78].mxu1  ;;  %3197 = vmatprep.mubr.msk.bf16.mxu0 %vm643_vm1, %v1113_v57 }
 0x212   :  { %v962_v63 = vadd.f32 %v3132_v62, %v3792_v21  ;;  %v953_v0 = vpop.f32.mrb[79].mxu1  ;;  %3198 = vmatmul.mubr.msk.bf16.gmra.mrb[72].mxu0 %vm643_vm1, %v1114_v56  ;;  %v1075_v2 = vmax.f32 %v959_v59, 0.0 }
 0x213   :  { %v954_v1 = vadd.f32 %v3792_v21, %v953_v0  ;;  %v1073_v4 = vmax.f32 %v951_v61, 0.0 }
 0x214   :  { %v1076_v3 = vmax.f32 %v962_v63, 0.0 }
 0x215   :  { %v1074_v5 = vmax.f32 %v954_v1, 0.0  ;;  %v3380_v1 = vld [vmem:[%s4438_s1 + $0x68] sm:$0xff]  }
 0x216   :  { %v1116_v6 = vpack.c.bf16 %v1076_v3, %v1075_v2  ;;  %3293 = vmatprep.subr.bf16.mxu0 %v3380_v1 }
 0x217   :  { %v1115_v7 = vpack.c.bf16 %v1074_v5, %v1073_v4  ;;  %v3135_v8 = vpop.f32.mrb[80].mxu1  ;;  %3294 = vmatpush3.bf16.msra.mxu0 %v3380_v1 }
 0x218   :  { %v975_v9 = vadd.f32 %v3135_v8, %v3792_v21  ;;  %v966_v10 = vpop.f32.mrb[81].mxu1 }
 0x219   :  { %v967_v12 = vadd.f32 %v3792_v21, %v966_v10  ;;  %v3136_v13 = vpop.f32.mrb[82].mxu1  ;;  %3201 = vmatprep.mubr.msk.bf16.mxu0 %vm643_vm1, %v1115_v7  ;;  %v3382_v10 = vld [vmem:[%s4438_s1 + $0x78] sm:$0xff]  }
 0x21a   :  { %v978_v16 = vadd.f32 %v3136_v13, %v3792_v21  ;;  %v969_v18 = vpop.f32.mrb[83].mxu1  ;;  %3202 = vmatmul.mubr.msk.bf16.gmra.mrb[76].mxu0 %vm643_vm1, %v1116_v6  ;;  %v1079_v20 = vmax.f32 %v975_v9, 0.0  ;;  %v3381_v9 = vld [vmem:[%s4438_s1 + $0x70] sm:$0xff]  }
 0x21b   :  { %v970_v19 = vadd.f32 %v3792_v21, %v969_v18  ;;  %v1077_v23 = vmax.f32 %v967_v12, 0.0  ;;  %3295 = vmatprep.subr.bf16.mxu0 %v3381_v9 }
 0x21c   :  { %v1080_v22 = vmax.f32 %v978_v16, 0.0  ;;  %3296 = vmatpush3.bf16.msra.mxu0 %v3381_v9 }
 0x21d   :  { %v1078_v25 = vmax.f32 %v970_v19, 0.0  ;;  %3297 = vmatprep.subr.bf16.mxu0 %v3382_v10 }
 0x21e   :  { %v1118_v26 = vpack.c.bf16 %v1080_v22, %v1079_v20  ;;  %v3383_v22 = vld [vmem:[%s4438_s1 + $0x80] sm:$0xff]  }
 0x21f   :  { %v1117_v27 = vpack.c.bf16 %v1078_v25, %v1077_v23  ;;  %v3139_v28 = vpop.f32.mrb[84].mxu1 }
 0x220   :  { %v991_v29 = vadd.f32 %v3139_v28, %v3792_v21  ;;  %v982_v30 = vpop.f32.mrb[85].mxu1  ;;  %3298 = vmatpush3.bf16.msra.mxu0 %v3382_v10 }
 0x221   :  { %v983_v37 = vadd.f32 %v3792_v21, %v982_v30  ;;  %v3140_v24 = vpop.f32.mrb[86].mxu1  ;;  %3205 = vmatprep.mubr.msk.bf16.mxu0 %vm643_vm1, %v1117_v27  ;;  %3299 = vmatprep.subr.bf16.mxu0 %v3383_v22 }
 0x222   :  { %v994_v50 = vadd.f32 %v3140_v24, %v3792_v21  ;;  %v985_v53 = vpop.f32.mrb[87].mxu1  ;;  %3206 = vmatmul.mubr.msk.bf16.gmra.mrb[80].mxu0 %vm643_vm1, %v1118_v26  ;;  %v1083_v17 = vmax.f32 %v991_v29, 0.0 }
 0x223   :  { %v986_v14 = vadd.f32 %v3792_v21, %v985_v53  ;;  %v1081_v48 = vmax.f32 %v983_v37, 0.0 }
 0x224   :  { %v1084_v45 = vmax.f32 %v994_v50, 0.0  ;;  %3300 = vmatpush3.bf16.msra.mxu0 %v3383_v22 }
 0x225   :  { %v1082_v11 = vmax.f32 %v986_v14, 0.0 }
 0x226   :  { %v1120_v15 = vpack.c.bf16 %v1084_v45, %v1083_v17 }
 0x227   :  { %v1119_v31 = vpack.c.bf16 %v1082_v11, %v1081_v48  ;;  %v3143_v32 = vpop.f32.mrb[88].mxu1 }
 0x228   :  { %v1007_v33 = vadd.f32 %v3143_v32, %v3792_v21  ;;  %v998_v34 = vpop.f32.mrb[89].mxu1 }
 0x229   :  { %v999_v35 = vadd.f32 %v3792_v21, %v998_v34  ;;  %v3144_v36 = vpop.f32.mrb[90].mxu1  ;;  %3209 = vmatprep.mubr.msk.bf16.mxu0 %vm643_vm1, %v1119_v31 }
 0x22a   :  { %v1010_v38 = vadd.f32 %v3144_v36, %v3792_v21  ;;  %v1001_v39 = vpop.f32.mrb[91].mxu1  ;;  %3210 = vmatmul.mubr.msk.bf16.gmra.mrb[84].mxu0 %vm643_vm1, %v1120_v15  ;;  %v1087_v41 = vmax.f32 %v1007_v33, 0.0 }
 0x22b   :  { %v1002_v40 = vadd.f32 %v3792_v21, %v1001_v39  ;;  %v1085_v43 = vmax.f32 %v999_v35, 0.0 }
 0x22c   :  { %v1088_v42 = vmax.f32 %v1010_v38, 0.0 }
 0x22d   :  { %v1086_v44 = vmax.f32 %v1002_v40, 0.0 }
 0x22e   :  { %v1122_v46 = vpack.c.bf16 %v1088_v42, %v1087_v41 }
 0x22f   :  { %v1121_v47 = vpack.c.bf16 %v1086_v44, %v1085_v43  ;;  %v3147_v49 = vpop.f32.mrb[92].mxu1 }
 0x230   :  { %v1023_v51 = vadd.f32 %v3147_v49, %v3792_v21  ;;  %v1014_v52 = vpop.f32.mrb[93].mxu1 }
 0x231   :  { %v1015_v54 = vadd.f32 %v3792_v21, %v1014_v52  ;;  %v3148_v55 = vpop.f32.mrb[94].mxu1  ;;  %3213 = vmatprep.mubr.msk.bf16.mxu0 %vm643_vm1, %v1121_v47 }
 0x232   :  { %v1026_v56 = vadd.f32 %v3148_v55, %v3792_v21  ;;  %v1017_v57 = vpop.f32.mrb[95].mxu1  ;;  %3214 = vmatmul.mubr.msk.bf16.gmra.mrb[88].mxu0 %vm643_vm1, %v1122_v46  ;;  %v1091_v59 = vmax.f32 %v1023_v51, 0.0 }
 0x233   :  { %v1018_v58 = vadd.f32 %v3792_v21, %v1017_v57  ;;  %v1089_v61 = vmax.f32 %v1015_v54, 0.0  ;;  %v3905_v21 = vld [vmem:[%s4440_s2 + $0x2] ss:$0 sm:$0xff] }
 0x234   :  { %v1092_v60 = vmax.f32 %v1026_v56, 0.0 }
 0x235   :  { %v1090_v62 = vmax.f32 %v1018_v58, 0.0 }
 0x236   :  { %v1124_v63 = vpack.c.bf16 %v1092_v60, %v1091_v59 }
 0x237   :  { %v1123_v0 = vpack.c.bf16 %v1090_v62, %v1089_v61 }
 0x239   :  { %3217 = vmatprep.mubr.msk.bf16.mxu0 %vm643_vm1, %v1123_v0 }
 0x23a   :  { %3218 = vmatmul.mubr.msk.bf16.gmra.mrb[92].mxu0 %vm643_vm1, %v1124_v63 }
 0x295   :  { %v3159_v2 = vpop.f32.mrb[32].mxu0 }
 0x296   :  { %v1301_v3 = vadd.f32 %v3159_v2, %v3905_v21  ;;  %v1292_v4 = vpop.f32.mrb[33].mxu0 }
 0x297   :  { %v1293_v5 = vadd.f32 %v3905_v21, %v1292_v4  ;;  %v3160_v6 = vpop.f32.mrb[34].mxu0 }
 0x298   :  { %v1304_v7 = vadd.f32 %v3160_v6, %v3905_v21  ;;  %v1295_v8 = vpop.f32.mrb[35].mxu0  ;;  %v1549_v13 = vmax.f32 %v1301_v3, 0.0 }
 0x299   :  { %v1296_v12 = vadd.f32 %v3905_v21, %v1295_v8  ;;  %v1547_v18 = vmax.f32 %v1293_v5, 0.0 }
 0x29a   :  { %v1550_v16 = vmax.f32 %v1304_v7, 0.0 }
 0x29b   :  { %v1548_v19 = vmax.f32 %v1296_v12, 0.0 }
 0x29c   :  { %v1612_v20 = vpack.c.bf16 %v1550_v16, %v1549_v13 }
 0x29d   :  { %v1611_v23 = vpack.c.bf16 %v1548_v19, %v1547_v18  ;;  %v3163_v25 = vpop.f32.mrb[36].mxu0 }
 0x29e   :  { %v1317_v26 = vadd.f32 %v3163_v25, %v3905_v21  ;;  %v1308_v27 = vpop.f32.mrb[37].mxu0 }
 0x29f   :  { %v1309_v28 = vadd.f32 %v3905_v21, %v1308_v27  ;;  %v3164_v29 = vpop.f32.mrb[38].mxu0  ;;  %3229 = vmatprep.mubr.msk.bf16.mxu1 %vm643_vm1, %v1611_v23 }
 0x2a0   :  { %v1320_v30 = vadd.f32 %v3164_v29, %v3905_v21  ;;  %v1311_v37 = vpop.f32.mrb[39].mxu0  ;;  %3230 = vmatmul.mubr.msk.bf16.vlgmr.msra.gmra.mrb[96].mxu1 %vm643_vm1, %v1612_v20  ;;  %v1553_v50 = vmax.f32 %v1317_v26, 0.0 }
 0x2a1   :  { %v1312_v24 = vadd.f32 %v3905_v21, %v1311_v37  ;;  %v1551_v14 = vmax.f32 %v1309_v28, 0.0 }
 0x2a2   :  { %v1554_v53 = vmax.f32 %v1320_v30, 0.0 }
 0x2a3   :  { %v1552_v17 = vmax.f32 %v1312_v24, 0.0 }
 0x2a4   :  { %v1614_v45 = vpack.c.bf16 %v1554_v53, %v1553_v50 }
 0x2a5   :  { %v1613_v48 = vpack.c.bf16 %v1552_v17, %v1551_v14  ;;  %v3167_v11 = vpop.f32.mrb[40].mxu0 }
 0x2a6   :  { %v1333_v15 = vadd.f32 %v3167_v11, %v3905_v21  ;;  %v1324_v31 = vpop.f32.mrb[41].mxu0 }
 0x2a7   :  { %v1325_v32 = vadd.f32 %v3905_v21, %v1324_v31  ;;  %v3168_v33 = vpop.f32.mrb[42].mxu0  ;;  %3233 = vmatprep.mubr.msk.bf16.mxu1 %vm643_vm1, %v1613_v48 }
 0x2a8   :  { %v1336_v34 = vadd.f32 %v3168_v33, %v3905_v21  ;;  %v1327_v35 = vpop.f32.mrb[43].mxu0  ;;  %3234 = vmatmul.mubr.msk.bf16.gmra.mrb[100].mxu1 %vm643_vm1, %v1614_v45  ;;  %v1557_v38 = vmax.f32 %v1333_v15, 0.0 }
 0x2a9   :  { %v1328_v36 = vadd.f32 %v3905_v21, %v1327_v35  ;;  %v1555_v40 = vmax.f32 %v1325_v32, 0.0 }
 0x2aa   :  { %v1558_v39 = vmax.f32 %v1336_v34, 0.0 }
 0x2ab   :  { %v1556_v41 = vmax.f32 %v1328_v36, 0.0 }
 0x2ac   :  { %v1616_v42 = vpack.c.bf16 %v1558_v39, %v1557_v38 }
 0x2ad   :  { %v1615_v43 = vpack.c.bf16 %v1556_v41, %v1555_v40  ;;  %v3171_v44 = vpop.f32.mrb[44].mxu0 }
 0x2ae   :  { %v1349_v46 = vadd.f32 %v3171_v44, %v3905_v21  ;;  %v1340_v47 = vpop.f32.mrb[45].mxu0 }
 0x2af   :  { %v1341_v49 = vadd.f32 %v3905_v21, %v1340_v47  ;;  %v3172_v51 = vpop.f32.mrb[46].mxu0  ;;  %3237 = vmatprep.mubr.msk.bf16.mxu1 %vm643_vm1, %v1615_v43 }
 0x2b0   :  { %v1352_v52 = vadd.f32 %v3172_v51, %v3905_v21  ;;  %v1343_v54 = vpop.f32.mrb[47].mxu0  ;;  %3238 = vmatmul.mubr.msk.bf16.gmra.mrb[104].mxu1 %vm643_vm1, %v1616_v42  ;;  %v1561_v56 = vmax.f32 %v1349_v46, 0.0 }
 0x2b1   :  { %v1344_v55 = vadd.f32 %v3905_v21, %v1343_v54  ;;  %v1559_v58 = vmax.f32 %v1341_v49, 0.0 }
 0x2b2   :  { %v1562_v57 = vmax.f32 %v1352_v52, 0.0 }
 0x2b3   :  { %v1560_v59 = vmax.f32 %v1344_v55, 0.0 }
 0x2b4   :  { %v1618_v60 = vpack.c.bf16 %v1562_v57, %v1561_v56 }
 0x2b5   :  { %v1617_v61 = vpack.c.bf16 %v1560_v59, %v1559_v58  ;;  %v3175_v62 = vpop.f32.mrb[48].mxu0 }
 0x2b6   :  { %v1365_v63 = vadd.f32 %v3175_v62, %v3905_v21  ;;  %v1356_v0 = vpop.f32.mrb[49].mxu0 }
 0x2b7   :  { %v1357_v1 = vadd.f32 %v3905_v21, %v1356_v0  ;;  %v3176_v2 = vpop.f32.mrb[50].mxu0  ;;  %3241 = vmatprep.mubr.msk.bf16.mxu1 %vm643_vm1, %v1617_v61 }
 0x2b8   :  { %v1368_v3 = vadd.f32 %v3176_v2, %v3905_v21  ;;  %v1359_v4 = vpop.f32.mrb[51].mxu0  ;;  %3242 = vmatmul.mubr.msk.bf16.gmra.mrb[108].mxu1 %vm643_vm1, %v1618_v60  ;;  %v1565_v6 = vmax.f32 %v1365_v63, 0.0 }
 0x2b9   :  { %v1360_v5 = vadd.f32 %v3905_v21, %v1359_v4  ;;  %v1563_v8 = vmax.f32 %v1357_v1, 0.0 }
 0x2ba   :  { %v1566_v7 = vmax.f32 %v1368_v3, 0.0 }
 0x2bb   :  { %v1564_v9 = vmax.f32 %v1360_v5, 0.0 }
 0x2bc   :  { %v1620_v10 = vpack.c.bf16 %v1566_v7, %v1565_v6 }
 0x2bd   :  { %v1619_v12 = vpack.c.bf16 %v1564_v9, %v1563_v8  ;;  %v3179_v13 = vpop.f32.mrb[52].mxu0 }
 0x2be   :  { %v1381_v16 = vadd.f32 %v3179_v13, %v3905_v21  ;;  %v1372_v18 = vpop.f32.mrb[53].mxu0 }
 0x2bf   :  { %v1373_v19 = vadd.f32 %v3905_v21, %v1372_v18  ;;  %v3180_v20 = vpop.f32.mrb[54].mxu0  ;;  %3245 = vmatprep.mubr.msk.bf16.mxu1 %vm643_vm1, %v1619_v12 }
 0x2c0   :  { %v1384_v22 = vadd.f32 %v3180_v20, %v3905_v21  ;;  %v1375_v23 = vpop.f32.mrb[55].mxu0  ;;  %3246 = vmatmul.mubr.msk.bf16.gmra.mrb[112].mxu1 %vm643_vm1, %v1620_v10  ;;  %v1569_v26 = vmax.f32 %v1381_v16, 0.0 }
 0x2c1   :  { %v1376_v25 = vadd.f32 %v3905_v21, %v1375_v23  ;;  %v1567_v28 = vmax.f32 %v1373_v19, 0.0 }
 0x2c2   :  { %v1570_v27 = vmax.f32 %v1384_v22, 0.0 }
 0x2c3   :  { %v1568_v29 = vmax.f32 %v1376_v25, 0.0 }
 0x2c4   :  { %v1622_v30 = vpack.c.bf16 %v1570_v27, %v1569_v26 }
 0x2c5   :  { %v1621_v37 = vpack.c.bf16 %v1568_v29, %v1567_v28  ;;  %v3183_v24 = vpop.f32.mrb[56].mxu0 }
 0x2c6   :  { %v1397_v50 = vadd.f32 %v3183_v24, %v3905_v21  ;;  %v1388_v53 = vpop.f32.mrb[57].mxu0 }
 0x2c7   :  { %v1389_v14 = vadd.f32 %v3905_v21, %v1388_v53  ;;  %v3184_v17 = vpop.f32.mrb[58].mxu0  ;;  %3249 = vmatprep.mubr.msk.bf16.mxu1 %vm643_vm1, %v1621_v37 }
 0x2c8   :  { %v1400_v45 = vadd.f32 %v3184_v17, %v3905_v21  ;;  %v1391_v48 = vpop.f32.mrb[59].mxu0  ;;  %3250 = vmatmul.mubr.msk.bf16.gmra.mrb[116].mxu1 %vm643_vm1, %v1622_v30  ;;  %v1573_v15 = vmax.f32 %v1397_v50, 0.0 }
 0x2c9   :  { %v1392_v11 = vadd.f32 %v3905_v21, %v1391_v48  ;;  %v1571_v32 = vmax.f32 %v1389_v14, 0.0 }
 0x2ca   :  { %v1574_v31 = vmax.f32 %v1400_v45, 0.0 }
 0x2cb   :  { %v1572_v33 = vmax.f32 %v1392_v11, 0.0 }
 0x2cc   :  { %v1624_v34 = vpack.c.bf16 %v1574_v31, %v1573_v15 }
 0x2cd   :  { %v1623_v35 = vpack.c.bf16 %v1572_v33, %v1571_v32  ;;  %v3187_v36 = vpop.f32.mrb[60].mxu0 }
 0x2ce   :  { %v1413_v38 = vadd.f32 %v3187_v36, %v3905_v21  ;;  %v1404_v39 = vpop.f32.mrb[61].mxu0 }
 0x2cf   :  { %v1405_v40 = vadd.f32 %v3905_v21, %v1404_v39  ;;  %v3188_v41 = vpop.f32.mrb[62].mxu0  ;;  %3253 = vmatprep.mubr.msk.bf16.mxu1 %vm643_vm1, %v1623_v35 }
 0x2d0   :  { %v1416_v42 = vadd.f32 %v3188_v41, %v3905_v21  ;;  %v1407_v43 = vpop.f32.mrb[63].mxu0  ;;  %3254 = vmatmul.mubr.msk.bf16.gmra.mrb[120].mxu1 %vm643_vm1, %v1624_v34  ;;  %v1577_v46 = vmax.f32 %v1413_v38, 0.0 }
 0x2d1   :  { %v1408_v44 = vadd.f32 %v3905_v21, %v1407_v43  ;;  %v1575_v49 = vmax.f32 %v1405_v40, 0.0 }
 0x2d2   :  { %v1578_v47 = vmax.f32 %v1416_v42, 0.0 }
 0x2d3   :  { %v1576_v51 = vmax.f32 %v1408_v44, 0.0 }
 0x2d4   :  { %v1626_v52 = vpack.c.bf16 %v1578_v47, %v1577_v46 }
 0x2d5   :  { %v1625_v54 = vpack.c.bf16 %v1576_v51, %v1575_v49  ;;  %v3191_v55 = vpop.f32.mrb[64].mxu0 }
 0x2d6   :  { %v1429_v56 = vadd.f32 %v3191_v55, %v3905_v21  ;;  %v1420_v57 = vpop.f32.mrb[65].mxu0 }
 0x2d7   :  { %v1421_v58 = vadd.f32 %v3905_v21, %v1420_v57  ;;  %v3192_v59 = vpop.f32.mrb[66].mxu0  ;;  %3257 = vmatprep.mubr.msk.bf16.mxu1 %vm643_vm1, %v1625_v54 }
 0x2d8   :  { %v1432_v60 = vadd.f32 %v3192_v59, %v3905_v21  ;;  %v1423_v61 = vpop.f32.mrb[67].mxu0  ;;  %3258 = vmatmul.mubr.msk.bf16.gmra.mrb[124].mxu1 %vm643_vm1, %v1626_v52  ;;  %v1581_v63 = vmax.f32 %v1429_v56, 0.0 }
 0x2d9   :  { %v1424_v62 = vadd.f32 %v3905_v21, %v1423_v61  ;;  %v1579_v1 = vmax.f32 %v1421_v58, 0.0 }
 0x2da   :  { %v1582_v0 = vmax.f32 %v1432_v60, 0.0 }
 0x2db   :  { %v1580_v2 = vmax.f32 %v1424_v62, 0.0 }
 0x2dc   :  { %v1628_v3 = vpack.c.bf16 %v1582_v0, %v1581_v63 }
 0x2dd   :  { %v1627_v4 = vpack.c.bf16 %v1580_v2, %v1579_v1  ;;  %v3195_v5 = vpop.f32.mrb[68].mxu0 }
 0x2de   :  { %v1445_v6 = vadd.f32 %v3195_v5, %v3905_v21  ;;  %v1436_v7 = vpop.f32.mrb[69].mxu0 }
 0x2df   :  { %v1437_v8 = vadd.f32 %v3905_v21, %v1436_v7  ;;  %v3196_v9 = vpop.f32.mrb[70].mxu0  ;;  %3261 = vmatprep.mubr.msk.bf16.mxu1 %vm643_vm1, %v1627_v4 }
 0x2e0   :  { %v1448_v10 = vadd.f32 %v3196_v9, %v3905_v21  ;;  %v1439_v12 = vpop.f32.mrb[71].mxu0  ;;  %3262 = vmatmul.mubr.msk.bf16.gmra.mrb[128].mxu1 %vm643_vm1, %v1628_v3  ;;  %v1585_v16 = vmax.f32 %v1445_v6, 0.0 }
 0x2e1   :  { %v1440_v13 = vadd.f32 %v3905_v21, %v1439_v12  ;;  %v1583_v19 = vmax.f32 %v1437_v8, 0.0 }
 0x2e2   :  { %v1586_v18 = vmax.f32 %v1448_v10, 0.0 }
 0x2e3   :  { %v1584_v20 = vmax.f32 %v1440_v13, 0.0 }
 0x2e4   :  { %v1630_v22 = vpack.c.bf16 %v1586_v18, %v1585_v16 }
 0x2e5   :  { %v1629_v23 = vpack.c.bf16 %v1584_v20, %v1583_v19  ;;  %v3199_v25 = vpop.f32.mrb[72].mxu0 }
 0x2e6   :  { %v1461_v26 = vadd.f32 %v3199_v25, %v3905_v21  ;;  %v1452_v27 = vpop.f32.mrb[73].mxu0 }
 0x2e7   :  { %v1453_v28 = vadd.f32 %v3905_v21, %v1452_v27  ;;  %v3200_v29 = vpop.f32.mrb[74].mxu0  ;;  %3265 = vmatprep.mubr.msk.bf16.mxu1 %vm643_vm1, %v1629_v23 }
 0x2e8   :  { %v1464_v30 = vadd.f32 %v3200_v29, %v3905_v21  ;;  %v1455_v37 = vpop.f32.mrb[75].mxu0  ;;  %3266 = vmatmul.mubr.msk.bf16.gmra.mrb[132].mxu1 %vm643_vm1, %v1630_v22  ;;  %v1589_v50 = vmax.f32 %v1461_v26, 0.0 }
 0x2e9   :  { %v1456_v24 = vadd.f32 %v3905_v21, %v1455_v37  ;;  %v1587_v14 = vmax.f32 %v1453_v28, 0.0 }
 0x2ea   :  { %v1590_v53 = vmax.f32 %v1464_v30, 0.0 }
 0x2eb   :  { %v1588_v17 = vmax.f32 %v1456_v24, 0.0 }
 0x2ec   :  { %v1632_v45 = vpack.c.bf16 %v1590_v53, %v1589_v50 }
 0x2ed   :  { %v1631_v48 = vpack.c.bf16 %v1588_v17, %v1587_v14  ;;  %v3203_v11 = vpop.f32.mrb[76].mxu0 }
 0x2ee   :  { %v1477_v15 = vadd.f32 %v3203_v11, %v3905_v21  ;;  %v1468_v31 = vpop.f32.mrb[77].mxu0 }
 0x2ef   :  { %v1469_v32 = vadd.f32 %v3905_v21, %v1468_v31  ;;  %v3204_v33 = vpop.f32.mrb[78].mxu0  ;;  %3269 = vmatprep.mubr.msk.bf16.mxu1 %vm643_vm1, %v1631_v48 }
 0x2f0   :  { %v1480_v34 = vadd.f32 %v3204_v33, %v3905_v21  ;;  %v1471_v35 = vpop.f32.mrb[79].mxu0  ;;  %3270 = vmatmul.mubr.msk.bf16.gmra.mrb[136].mxu1 %vm643_vm1, %v1632_v45  ;;  %v1593_v38 = vmax.f32 %v1477_v15, 0.0 }
 0x2f1   :  { %v1472_v36 = vadd.f32 %v3905_v21, %v1471_v35  ;;  %v1591_v40 = vmax.f32 %v1469_v32, 0.0 }
 0x2f2   :  { %v1594_v39 = vmax.f32 %v1480_v34, 0.0 }
 0x2f3   :  { %v1592_v41 = vmax.f32 %v1472_v36, 0.0  ;;  %v4015_v36 = vld [vmem:[%s4440_s2 + $0x3] ss:$0 sm:$0xff] }
 0x2f4   :  { %v1634_v42 = vpack.c.bf16 %v1594_v39, %v1593_v38 }
 0x2f5   :  { %v1633_v43 = vpack.c.bf16 %v1592_v41, %v1591_v40  ;;  %v3207_v44 = vpop.f32.mrb[80].mxu0 }
 0x2f6   :  { %v1493_v46 = vadd.f32 %v3207_v44, %v3905_v21  ;;  %v1484_v47 = vpop.f32.mrb[81].mxu0 }
 0x2f7   :  { %v1485_v49 = vadd.f32 %v3905_v21, %v1484_v47  ;;  %v3208_v51 = vpop.f32.mrb[82].mxu0  ;;  %3273 = vmatprep.mubr.msk.bf16.mxu1 %vm643_vm1, %v1633_v43 }
 0x2f8   :  { %v1496_v52 = vadd.f32 %v3208_v51, %v3905_v21  ;;  %v1487_v54 = vpop.f32.mrb[83].mxu0  ;;  %3274 = vmatmul.mubr.msk.bf16.gmra.mrb[140].mxu1 %vm643_vm1, %v1634_v42  ;;  %v1597_v56 = vmax.f32 %v1493_v46, 0.0 }
 0x2f9   :  { %v1488_v55 = vadd.f32 %v3905_v21, %v1487_v54  ;;  %v1595_v58 = vmax.f32 %v1485_v49, 0.0 }
 0x2fa   :  { %v1598_v57 = vmax.f32 %v1496_v52, 0.0 }
 0x2fb   :  { %v1596_v59 = vmax.f32 %v1488_v55, 0.0 }
 0x2fc   :  { %v1636_v60 = vpack.c.bf16 %v1598_v57, %v1597_v56 }
 0x2fd   :  { %v1635_v61 = vpack.c.bf16 %v1596_v59, %v1595_v58  ;;  %v3211_v62 = vpop.f32.mrb[84].mxu0 }
 0x2fe   :  { %v1509_v63 = vadd.f32 %v3211_v62, %v3905_v21  ;;  %v1500_v0 = vpop.f32.mrb[85].mxu0 }
 0x2ff   :  { %v1501_v1 = vadd.f32 %v3905_v21, %v1500_v0  ;;  %v3212_v2 = vpop.f32.mrb[86].mxu0  ;;  %3277 = vmatprep.mubr.msk.bf16.mxu1 %vm643_vm1, %v1635_v61 }
 0x300   :  { %v1512_v3 = vadd.f32 %v3212_v2, %v3905_v21  ;;  %v1503_v4 = vpop.f32.mrb[87].mxu0  ;;  %3278 = vmatmul.mubr.msk.bf16.gmra.mrb[144].mxu1 %vm643_vm1, %v1636_v60  ;;  %v1601_v6 = vmax.f32 %v1509_v63, 0.0 }
 0x301   :  { %v1504_v5 = vadd.f32 %v3905_v21, %v1503_v4  ;;  %v1599_v8 = vmax.f32 %v1501_v1, 0.0 }
 0x302   :  { %v1602_v7 = vmax.f32 %v1512_v3, 0.0 }
 0x303   :  { %v1600_v9 = vmax.f32 %v1504_v5, 0.0 }
 0x304   :  { %v1638_v10 = vpack.c.bf16 %v1602_v7, %v1601_v6 }
 0x305   :  { %v1637_v12 = vpack.c.bf16 %v1600_v9, %v1599_v8  ;;  %v3215_v13 = vpop.f32.mrb[88].mxu0 }
 0x306   :  { %v1525_v16 = vadd.f32 %v3215_v13, %v3905_v21  ;;  %v1516_v18 = vpop.f32.mrb[89].mxu0 }
 0x307   :  { %v1517_v19 = vadd.f32 %v3905_v21, %v1516_v18  ;;  %v3216_v20 = vpop.f32.mrb[90].mxu0  ;;  %3281 = vmatprep.mubr.msk.bf16.mxu1 %vm643_vm1, %v1637_v12 }
 0x308   :  { %v1528_v22 = vadd.f32 %v3216_v20, %v3905_v21  ;;  %v1519_v23 = vpop.f32.mrb[91].mxu0  ;;  %3282 = vmatmul.mubr.msk.bf16.gmra.mrb[148].mxu1 %vm643_vm1, %v1638_v10  ;;  %v1605_v26 = vmax.f32 %v1525_v16, 0.0 }
 0x309   :  { %v1520_v25 = vadd.f32 %v3905_v21, %v1519_v23  ;;  %v1603_v28 = vmax.f32 %v1517_v19, 0.0 }
 0x30a   :  { %v1606_v27 = vmax.f32 %v1528_v22, 0.0 }
 0x30b   :  { %v1604_v29 = vmax.f32 %v1520_v25, 0.0 }
 0x30c   :  { %v1640_v30 = vpack.c.bf16 %v1606_v27, %v1605_v26 }
 0x30d   :  { %v1639_v37 = vpack.c.bf16 %v1604_v29, %v1603_v28  ;;  %v3219_v24 = vpop.f32.mrb[92].mxu0 }
 0x30e   :  { %v1541_v50 = vadd.f32 %v3219_v24, %v3905_v21  ;;  %v1532_v53 = vpop.f32.mrb[93].mxu0 }
 0x30f   :  { %v1533_v14 = vadd.f32 %v3905_v21, %v1532_v53  ;;  %v3220_v17 = vpop.f32.mrb[94].mxu0  ;;  %3285 = vmatprep.mubr.msk.bf16.mxu1 %vm643_vm1, %v1639_v37 }
 0x310   :  { %v1544_v45 = vadd.f32 %v3220_v17, %v3905_v21  ;;  %v1535_v48 = vpop.f32.mrb[95].mxu0  ;;  %3286 = vmatmul.mubr.msk.bf16.gmra.mrb[152].mxu1 %vm643_vm1, %v1640_v30  ;;  %v1609_v15 = vmax.f32 %v1541_v50, 0.0 }
 0x311   :  { %v1536_v11 = vadd.f32 %v3905_v21, %v1535_v48  ;;  %v1607_v32 = vmax.f32 %v1533_v14, 0.0 }
 0x312   :  { %v1610_v31 = vmax.f32 %v1544_v45, 0.0 }
 0x313   :  { %v1608_v33 = vmax.f32 %v1536_v11, 0.0 }
 0x314   :  { %v1642_v34 = vpack.c.bf16 %v1610_v31, %v1609_v15 }
 0x315   :  { %v1641_v35 = vpack.c.bf16 %v1608_v33, %v1607_v32 }
 0x317   :  { %3289 = vmatprep.mubr.msk.bf16.mxu1 %vm643_vm1, %v1641_v35 }
 0x318   :  { %3290 = vmatmul.mubr.msk.bf16.gmra.mrb[156].mxu1 %vm643_vm1, %v1642_v34 }
 0x373   :  { %v3231_v38 = vpop.f32.mrb[96].mxu1 }
 0x374   :  { %v1819_v39 = vadd.f32 %v3231_v38, %v4015_v36  ;;  %v1810_v40 = vpop.f32.mrb[97].mxu1 }
 0x375   :  { %v1811_v21 = vadd.f32 %v4015_v36, %v1810_v40  ;;  %v3232_v41 = vpop.f32.mrb[98].mxu1 }
 0x376   :  { %v1822_v42 = vadd.f32 %v3232_v41, %v4015_v36  ;;  %v1813_v43 = vpop.f32.mrb[99].mxu1  ;;  %v2067_v46 = vmax.f32 %v1819_v39, 0.0 }
 0x377   :  { %v1814_v44 = vadd.f32 %v4015_v36, %v1813_v43  ;;  %v2065_v49 = vmax.f32 %v1811_v21, 0.0 }
 0x378   :  { %v2068_v47 = vmax.f32 %v1822_v42, 0.0 }
 0x379   :  { %v2066_v51 = vmax.f32 %v1814_v44, 0.0 }
 0x37a   :  { %v2130_v52 = vpack.c.bf16 %v2068_v47, %v2067_v46 }
 0x37b   :  { %v2129_v54 = vpack.c.bf16 %v2066_v51, %v2065_v49  ;;  %v3235_v55 = vpop.f32.mrb[100].mxu1 }
 0x37c   :  { %v1835_v56 = vadd.f32 %v3235_v55, %v4015_v36  ;;  %v1826_v57 = vpop.f32.mrb[101].mxu1 }
 0x37d   :  { %v1827_v58 = vadd.f32 %v4015_v36, %v1826_v57  ;;  %v3236_v59 = vpop.f32.mrb[102].mxu1  ;;  %3301 = vmatprep.mubr.msk.bf16.mxu0 %vm643_vm1, %v2129_v54 }
 0x37e   :  { %v1838_v60 = vadd.f32 %v3236_v59, %v4015_v36  ;;  %v1829_v61 = vpop.f32.mrb[103].mxu1  ;;  %3302 = vmatmul.mubr.msk.bf16.vlgmr.msra.gmra.mrb[96].mxu0 %vm643_vm1, %v2130_v52  ;;  %v2071_v63 = vmax.f32 %v1835_v56, 0.0 }
 0x37f   :  { %v1830_v62 = vadd.f32 %v4015_v36, %v1829_v61  ;;  %v2069_v1 = vmax.f32 %v1827_v58, 0.0 }
 0x380   :  { %v2072_v0 = vmax.f32 %v1838_v60, 0.0 }
 0x381   :  { %v2070_v2 = vmax.f32 %v1830_v62, 0.0 }
 0x382   :  { %v2132_v3 = vpack.c.bf16 %v2072_v0, %v2071_v63 }
 0x383   :  { %v2131_v4 = vpack.c.bf16 %v2070_v2, %v2069_v1  ;;  %v3239_v5 = vpop.f32.mrb[104].mxu1 }
 0x384   :  { %v1851_v6 = vadd.f32 %v3239_v5, %v4015_v36  ;;  %v1842_v7 = vpop.f32.mrb[105].mxu1 }
 0x385   :  { %v1843_v8 = vadd.f32 %v4015_v36, %v1842_v7  ;;  %v3240_v9 = vpop.f32.mrb[106].mxu1  ;;  %3305 = vmatprep.mubr.msk.bf16.mxu0 %vm643_vm1, %v2131_v4 }
 0x386   :  { %v1854_v10 = vadd.f32 %v3240_v9, %v4015_v36  ;;  %v1845_v12 = vpop.f32.mrb[107].mxu1  ;;  %3306 = vmatmul.mubr.msk.bf16.gmra.mrb[100].mxu0 %vm643_vm1, %v2132_v3  ;;  %v2075_v16 = vmax.f32 %v1851_v6, 0.0 }
 0x387   :  { %v1846_v13 = vadd.f32 %v4015_v36, %v1845_v12  ;;  %v2073_v19 = vmax.f32 %v1843_v8, 0.0 }
 0x388   :  { %v2076_v18 = vmax.f32 %v1854_v10, 0.0 }
 0x389   :  { %v2074_v20 = vmax.f32 %v1846_v13, 0.0 }
 0x38a   :  { %v2134_v22 = vpack.c.bf16 %v2076_v18, %v2075_v16 }
 0x38b   :  { %v2133_v23 = vpack.c.bf16 %v2074_v20, %v2073_v19  ;;  %v3243_v25 = vpop.f32.mrb[108].mxu1 }
 0x38c   :  { %v1867_v26 = vadd.f32 %v3243_v25, %v4015_v36  ;;  %v1858_v27 = vpop.f32.mrb[109].mxu1 }
 0x38d   :  { %v1859_v28 = vadd.f32 %v4015_v36, %v1858_v27  ;;  %v3244_v29 = vpop.f32.mrb[110].mxu1  ;;  %3309 = vmatprep.mubr.msk.bf16.mxu0 %vm643_vm1, %v2133_v23 }
 0x38e   :  { %v1870_v30 = vadd.f32 %v3244_v29, %v4015_v36  ;;  %v1861_v37 = vpop.f32.mrb[111].mxu1  ;;  %3310 = vmatmul.mubr.msk.bf16.gmra.mrb[104].mxu0 %vm643_vm1, %v2134_v22  ;;  %v2079_v50 = vmax.f32 %v1867_v26, 0.0 }
 0x38f   :  { %v1862_v24 = vadd.f32 %v4015_v36, %v1861_v37  ;;  %v2077_v14 = vmax.f32 %v1859_v28, 0.0 }
 0x390   :  { %v2080_v53 = vmax.f32 %v1870_v30, 0.0 }
 0x391   :  { %v2078_v17 = vmax.f32 %v1862_v24, 0.0 }
 0x392   :  { %v2136_v45 = vpack.c.bf16 %v2080_v53, %v2079_v50 }
 0x393   :  { %v2135_v48 = vpack.c.bf16 %v2078_v17, %v2077_v14  ;;  %v3247_v11 = vpop.f32.mrb[112].mxu1 }
 0x394   :  { %v1883_v15 = vadd.f32 %v3247_v11, %v4015_v36  ;;  %v1874_v31 = vpop.f32.mrb[113].mxu1 }
 0x395   :  { %v1875_v32 = vadd.f32 %v4015_v36, %v1874_v31  ;;  %v3248_v33 = vpop.f32.mrb[114].mxu1  ;;  %3313 = vmatprep.mubr.msk.bf16.mxu0 %vm643_vm1, %v2135_v48 }
 0x396   :  { %v1886_v34 = vadd.f32 %v3248_v33, %v4015_v36  ;;  %v1877_v35 = vpop.f32.mrb[115].mxu1  ;;  %3314 = vmatmul.mubr.msk.bf16.gmra.mrb[108].mxu0 %vm643_vm1, %v2136_v45  ;;  %v2083_v39 = vmax.f32 %v1883_v15, 0.0 }
 0x397   :  { %v1878_v38 = vadd.f32 %v4015_v36, %v1877_v35  ;;  %v2081_v21 = vmax.f32 %v1875_v32, 0.0 }
 0x398   :  { %v2084_v40 = vmax.f32 %v1886_v34, 0.0 }
 0x399   :  { %v2082_v41 = vmax.f32 %v1878_v38, 0.0 }
 0x39a   :  { %v2138_v42 = vpack.c.bf16 %v2084_v40, %v2083_v39 }
 0x39b   :  { %v2137_v43 = vpack.c.bf16 %v2082_v41, %v2081_v21  ;;  %v3251_v44 = vpop.f32.mrb[116].mxu1 }
 0x39c   :  { %v1899_v46 = vadd.f32 %v3251_v44, %v4015_v36  ;;  %v1890_v47 = vpop.f32.mrb[117].mxu1 }
 0x39d   :  { %v1891_v49 = vadd.f32 %v4015_v36, %v1890_v47  ;;  %v3252_v51 = vpop.f32.mrb[118].mxu1  ;;  %3317 = vmatprep.mubr.msk.bf16.mxu0 %vm643_vm1, %v2137_v43 }
 0x39e   :  { %v1902_v52 = vadd.f32 %v3252_v51, %v4015_v36  ;;  %v1893_v54 = vpop.f32.mrb[119].mxu1  ;;  %3318 = vmatmul.mubr.msk.bf16.gmra.mrb[112].mxu0 %vm643_vm1, %v2138_v42  ;;  %v2087_v56 = vmax.f32 %v1899_v46, 0.0 }
 0x39f   :  { %v1894_v55 = vadd.f32 %v4015_v36, %v1893_v54  ;;  %v2085_v58 = vmax.f32 %v1891_v49, 0.0 }
 0x3a0   :  { %v2088_v57 = vmax.f32 %v1902_v52, 0.0 }
 0x3a1   :  { %v2086_v59 = vmax.f32 %v1894_v55, 0.0 }
 0x3a2   :  { %v2140_v60 = vpack.c.bf16 %v2088_v57, %v2087_v56 }
 0x3a3   :  { %v2139_v61 = vpack.c.bf16 %v2086_v59, %v2085_v58  ;;  %v3255_v62 = vpop.f32.mrb[120].mxu1 }
 0x3a4   :  { %v1915_v63 = vadd.f32 %v3255_v62, %v4015_v36  ;;  %v1906_v0 = vpop.f32.mrb[121].mxu1 }
 0x3a5   :  { %v1907_v1 = vadd.f32 %v4015_v36, %v1906_v0  ;;  %v3256_v2 = vpop.f32.mrb[122].mxu1  ;;  %3321 = vmatprep.mubr.msk.bf16.mxu0 %vm643_vm1, %v2139_v61 }
 0x3a6   :  { %v1918_v3 = vadd.f32 %v3256_v2, %v4015_v36  ;;  %v1909_v4 = vpop.f32.mrb[123].mxu1  ;;  %3322 = vmatmul.mubr.msk.bf16.gmra.mrb[116].mxu0 %vm643_vm1, %v2140_v60  ;;  %v2091_v6 = vmax.f32 %v1915_v63, 0.0 }
 0x3a7   :  { %v1910_v5 = vadd.f32 %v4015_v36, %v1909_v4  ;;  %v2089_v8 = vmax.f32 %v1907_v1, 0.0 }
 0x3a8   :  { %v2092_v7 = vmax.f32 %v1918_v3, 0.0 }
 0x3a9   :  { %v2090_v9 = vmax.f32 %v1910_v5, 0.0 }
 0x3aa   :  { %v2142_v10 = vpack.c.bf16 %v2092_v7, %v2091_v6 }
 0x3ab   :  { %v2141_v12 = vpack.c.bf16 %v2090_v9, %v2089_v8  ;;  %v3259_v13 = vpop.f32.mrb[124].mxu1 }
 0x3ac   :  { %v1931_v16 = vadd.f32 %v3259_v13, %v4015_v36  ;;  %v1922_v18 = vpop.f32.mrb[125].mxu1 }
 0x3ad   :  { %v1923_v19 = vadd.f32 %v4015_v36, %v1922_v18  ;;  %v3260_v20 = vpop.f32.mrb[126].mxu1  ;;  %3325 = vmatprep.mubr.msk.bf16.mxu0 %vm643_vm1, %v2141_v12 }
 0x3ae   :  { %v1934_v22 = vadd.f32 %v3260_v20, %v4015_v36  ;;  %v1925_v23 = vpop.f32.mrb[127].mxu1  ;;  %3326 = vmatmul.mubr.msk.bf16.gmra.mrb[120].mxu0 %vm643_vm1, %v2142_v10  ;;  %v2095_v26 = vmax.f32 %v1931_v16, 0.0 }
 0x3af   :  { %v1926_v25 = vadd.f32 %v4015_v36, %v1925_v23  ;;  %v2093_v28 = vmax.f32 %v1923_v19, 0.0 }
 0x3b0   :  { %v2096_v27 = vmax.f32 %v1934_v22, 0.0 }
 0x3b1   :  { %v2094_v29 = vmax.f32 %v1926_v25, 0.0 }
 0x3b2   :  { %v2144_v30 = vpack.c.bf16 %v2096_v27, %v2095_v26 }
 0x3b3   :  { %v2143_v37 = vpack.c.bf16 %v2094_v29, %v2093_v28  ;;  %v3263_v24 = vpop.f32.mrb[128].mxu1 }
 0x3b4   :  { %v1947_v50 = vadd.f32 %v3263_v24, %v4015_v36  ;;  %v1938_v53 = vpop.f32.mrb[129].mxu1 }
 0x3b5   :  { %v1939_v14 = vadd.f32 %v4015_v36, %v1938_v53  ;;  %v3264_v17 = vpop.f32.mrb[130].mxu1  ;;  %3329 = vmatprep.mubr.msk.bf16.mxu0 %vm643_vm1, %v2143_v37 }
 0x3b6   :  { %v1950_v45 = vadd.f32 %v3264_v17, %v4015_v36  ;;  %v1941_v48 = vpop.f32.mrb[131].mxu1  ;;  %3330 = vmatmul.mubr.msk.bf16.gmra.mrb[124].mxu0 %vm643_vm1, %v2144_v30  ;;  %v2099_v15 = vmax.f32 %v1947_v50, 0.0 }
 0x3b7   :  { %v1942_v11 = vadd.f32 %v4015_v36, %v1941_v48  ;;  %v2097_v32 = vmax.f32 %v1939_v14, 0.0 }
 0x3b8   :  { %v2100_v31 = vmax.f32 %v1950_v45, 0.0 }
 0x3b9   :  { %v2098_v33 = vmax.f32 %v1942_v11, 0.0 }
 0x3ba   :  { %v2146_v34 = vpack.c.bf16 %v2100_v31, %v2099_v15 }
 0x3bb   :  { %v2145_v35 = vpack.c.bf16 %v2098_v33, %v2097_v32  ;;  %v3267_v38 = vpop.f32.mrb[132].mxu1 }
 0x3bc   :  { %v1963_v39 = vadd.f32 %v3267_v38, %v4015_v36  ;;  %v1954_v40 = vpop.f32.mrb[133].mxu1 }
 0x3bd   :  { %v1955_v21 = vadd.f32 %v4015_v36, %v1954_v40  ;;  %v3268_v41 = vpop.f32.mrb[134].mxu1  ;;  %3333 = vmatprep.mubr.msk.bf16.mxu0 %vm643_vm1, %v2145_v35 }
 0x3be   :  { %v1966_v42 = vadd.f32 %v3268_v41, %v4015_v36  ;;  %v1957_v43 = vpop.f32.mrb[135].mxu1  ;;  %3334 = vmatmul.mubr.msk.bf16.gmra.mrb[128].mxu0 %vm643_vm1, %v2146_v34  ;;  %v2103_v46 = vmax.f32 %v1963_v39, 0.0 }
 0x3bf   :  { %v1958_v44 = vadd.f32 %v4015_v36, %v1957_v43  ;;  %v2101_v49 = vmax.f32 %v1955_v21, 0.0 }
 0x3c0   :  { %v2104_v47 = vmax.f32 %v1966_v42, 0.0 }
 0x3c1   :  { %v2102_v51 = vmax.f32 %v1958_v44, 0.0 }
 0x3c2   :  { %v2148_v52 = vpack.c.bf16 %v2104_v47, %v2103_v46 }
 0x3c3   :  { %v2147_v54 = vpack.c.bf16 %v2102_v51, %v2101_v49  ;;  %v3271_v55 = vpop.f32.mrb[136].mxu1 }
 0x3c4   :  { %v1979_v56 = vadd.f32 %v3271_v55, %v4015_v36  ;;  %v1970_v57 = vpop.f32.mrb[137].mxu1 }
 0x3c5   :  { %v1971_v58 = vadd.f32 %v4015_v36, %v1970_v57  ;;  %v3272_v59 = vpop.f32.mrb[138].mxu1  ;;  %3337 = vmatprep.mubr.msk.bf16.mxu0 %vm643_vm1, %v2147_v54 }
 0x3c6   :  { %v1982_v60 = vadd.f32 %v3272_v59, %v4015_v36  ;;  %v1973_v61 = vpop.f32.mrb[139].mxu1  ;;  %3338 = vmatmul.mubr.msk.bf16.gmra.mrb[132].mxu0 %vm643_vm1, %v2148_v52  ;;  %v2107_v63 = vmax.f32 %v1979_v56, 0.0 }
 0x3c7   :  { %v1974_v62 = vadd.f32 %v4015_v36, %v1973_v61  ;;  %v2105_v1 = vmax.f32 %v1971_v58, 0.0 }
 0x3c8   :  { %v2108_v0 = vmax.f32 %v1982_v60, 0.0 }
 0x3c9   :  { %v2106_v2 = vmax.f32 %v1974_v62, 0.0 }
 0x3ca   :  { %v2150_v3 = vpack.c.bf16 %v2108_v0, %v2107_v63 }
 0x3cb   :  { %v2149_v4 = vpack.c.bf16 %v2106_v2, %v2105_v1  ;;  %v3275_v5 = vpop.f32.mrb[140].mxu1 }
 0x3cc   :  { %v1995_v6 = vadd.f32 %v3275_v5, %v4015_v36  ;;  %v1986_v7 = vpop.f32.mrb[141].mxu1 }
 0x3cd   :  { %v1987_v8 = vadd.f32 %v4015_v36, %v1986_v7  ;;  %v3276_v9 = vpop.f32.mrb[142].mxu1  ;;  %3341 = vmatprep.mubr.msk.bf16.mxu0 %vm643_vm1, %v2149_v4 }
 0x3ce   :  { %v1998_v10 = vadd.f32 %v3276_v9, %v4015_v36  ;;  %v1989_v12 = vpop.f32.mrb[143].mxu1  ;;  %3342 = vmatmul.mubr.msk.bf16.gmra.mrb[136].mxu0 %vm643_vm1, %v2150_v3  ;;  %v2111_v16 = vmax.f32 %v1995_v6, 0.0 }
 0x3cf   :  { %v1990_v13 = vadd.f32 %v4015_v36, %v1989_v12  ;;  %v2109_v19 = vmax.f32 %v1987_v8, 0.0 }
 0x3d0   :  { %v2112_v18 = vmax.f32 %v1998_v10, 0.0 }
 0x3d1   :  { %v2110_v20 = vmax.f32 %v1990_v13, 0.0  ;;  %v4116_v13 = vld [vmem:[%s4440_s2 + $0x4] ss:$0 sm:$0xff] }
 0x3d2   :  { %v2152_v22 = vpack.c.bf16 %v2112_v18, %v2111_v16 }
 0x3d3   :  { %v2151_v23 = vpack.c.bf16 %v2110_v20, %v2109_v19  ;;  %v3279_v25 = vpop.f32.mrb[144].mxu1 }
 0x3d4   :  { %v2011_v26 = vadd.f32 %v3279_v25, %v4015_v36  ;;  %v2002_v27 = vpop.f32.mrb[145].mxu1 }
 0x3d5   :  { %v2003_v28 = vadd.f32 %v4015_v36, %v2002_v27  ;;  %v3280_v29 = vpop.f32.mrb[146].mxu1  ;;  %3345 = vmatprep.mubr.msk.bf16.mxu0 %vm643_vm1, %v2151_v23 }
 0x3d6   :  { %v2014_v30 = vadd.f32 %v3280_v29, %v4015_v36  ;;  %v2005_v37 = vpop.f32.mrb[147].mxu1  ;;  %3346 = vmatmul.mubr.msk.bf16.gmra.mrb[140].mxu0 %vm643_vm1, %v2152_v22  ;;  %v2115_v50 = vmax.f32 %v2011_v26, 0.0 }
 0x3d7   :  { %v2006_v24 = vadd.f32 %v4015_v36, %v2005_v37  ;;  %v2113_v14 = vmax.f32 %v2003_v28, 0.0 }
 0x3d8   :  { %v2116_v53 = vmax.f32 %v2014_v30, 0.0 }
 0x3d9   :  { %v2114_v17 = vmax.f32 %v2006_v24, 0.0 }
 0x3da   :  { %v2154_v45 = vpack.c.bf16 %v2116_v53, %v2115_v50 }
 0x3db   :  { %v2153_v48 = vpack.c.bf16 %v2114_v17, %v2113_v14  ;;  %v3283_v11 = vpop.f32.mrb[148].mxu1 }
 0x3dc   :  { %v2027_v15 = vadd.f32 %v3283_v11, %v4015_v36  ;;  %v2018_v31 = vpop.f32.mrb[149].mxu1 }
 0x3dd   :  { %v2019_v32 = vadd.f32 %v4015_v36, %v2018_v31  ;;  %v3284_v33 = vpop.f32.mrb[150].mxu1  ;;  %3349 = vmatprep.mubr.msk.bf16.mxu0 %vm643_vm1, %v2153_v48 }
 0x3de   :  { %v2030_v34 = vadd.f32 %v3284_v33, %v4015_v36  ;;  %v2021_v35 = vpop.f32.mrb[151].mxu1  ;;  %3350 = vmatmul.mubr.msk.bf16.gmra.mrb[144].mxu0 %vm643_vm1, %v2154_v45  ;;  %v2119_v39 = vmax.f32 %v2027_v15, 0.0 }
 0x3df   :  { %v2022_v38 = vadd.f32 %v4015_v36, %v2021_v35  ;;  %v2117_v21 = vmax.f32 %v2019_v32, 0.0 }
 0x3e0   :  { %v2120_v40 = vmax.f32 %v2030_v34, 0.0 }
 0x3e1   :  { %v2118_v41 = vmax.f32 %v2022_v38, 0.0 }
 0x3e2   :  { %v2156_v42 = vpack.c.bf16 %v2120_v40, %v2119_v39 }
 0x3e3   :  { %v2155_v43 = vpack.c.bf16 %v2118_v41, %v2117_v21  ;;  %v3287_v44 = vpop.f32.mrb[152].mxu1 }
 0x3e4   :  { %v2043_v46 = vadd.f32 %v3287_v44, %v4015_v36  ;;  %v2034_v47 = vpop.f32.mrb[153].mxu1 }
 0x3e5   :  { %v2035_v49 = vadd.f32 %v4015_v36, %v2034_v47  ;;  %v3288_v51 = vpop.f32.mrb[154].mxu1  ;;  %3353 = vmatprep.mubr.msk.bf16.mxu0 %vm643_vm1, %v2155_v43 }
 0x3e6   :  { %v2046_v52 = vadd.f32 %v3288_v51, %v4015_v36  ;;  %v2037_v54 = vpop.f32.mrb[155].mxu1  ;;  %3354 = vmatmul.mubr.msk.bf16.gmra.mrb[148].mxu0 %vm643_vm1, %v2156_v42  ;;  %v2123_v56 = vmax.f32 %v2043_v46, 0.0 }
 0x3e7   :  { %v2038_v55 = vadd.f32 %v4015_v36, %v2037_v54  ;;  %v2121_v58 = vmax.f32 %v2035_v49, 0.0 }
 0x3e8   :  { %v2124_v57 = vmax.f32 %v2046_v52, 0.0 }
 0x3e9   :  { %v2122_v59 = vmax.f32 %v2038_v55, 0.0 }
 0x3ea   :  { %v2158_v60 = vpack.c.bf16 %v2124_v57, %v2123_v56 }
 0x3eb   :  { %v2157_v61 = vpack.c.bf16 %v2122_v59, %v2121_v58  ;;  %v3291_v62 = vpop.f32.mrb[156].mxu1 }
 0x3ec   :  { %v2059_v63 = vadd.f32 %v3291_v62, %v4015_v36  ;;  %v2050_v0 = vpop.f32.mrb[157].mxu1 }
 0x3ed   :  { %v2051_v1 = vadd.f32 %v4015_v36, %v2050_v0  ;;  %v3292_v2 = vpop.f32.mrb[158].mxu1  ;;  %3357 = vmatprep.mubr.msk.bf16.mxu0 %vm643_vm1, %v2157_v61 }
 0x3ee   :  { %v2062_v3 = vadd.f32 %v3292_v2, %v4015_v36  ;;  %v2053_v4 = vpop.f32.mrb[159].mxu1  ;;  %3358 = vmatmul.mubr.msk.bf16.gmra.mrb[152].mxu0 %vm643_vm1, %v2158_v60  ;;  %v2127_v6 = vmax.f32 %v2059_v63, 0.0 }
 0x3ef   :  { %v2054_v5 = vadd.f32 %v4015_v36, %v2053_v4  ;;  %v2125_v8 = vmax.f32 %v2051_v1, 0.0 }
 0x3f0   :  { %v2128_v7 = vmax.f32 %v2062_v3, 0.0 }
 0x3f1   :  { %v2126_v9 = vmax.f32 %v2054_v5, 0.0 }
 0x3f2   :  { %v2160_v10 = vpack.c.bf16 %v2128_v7, %v2127_v6 }
 0x3f3   :  { %v2159_v12 = vpack.c.bf16 %v2126_v9, %v2125_v8 }
 0x3f5   :  { %3361 = vmatprep.mubr.msk.bf16.mxu0 %vm643_vm1, %v2159_v12 }
 0x3f6   :  { %3362 = vmatmul.mubr.msk.bf16.gmra.mrb[156].mxu0 %vm643_vm1, %v2160_v10 }
 0x451   :  { %v3303_v16 = vpop.f32.mrb[96].mxu0 }
 0x452   :  { %v2337_v18 = vadd.f32 %v3303_v16, %v4116_v13  ;;  %v2328_v36 = vpop.f32.mrb[97].mxu0 }
 0x453   :  { %v2329_v19 = vadd.f32 %v4116_v13, %v2328_v36  ;;  %v3304_v20 = vpop.f32.mrb[98].mxu0 }
 0x454   :  { %2586 = vst.msk [vmem:[%s4441_s3 + $0x10] sm:$0xff] %vm2583_vm2, %v2337_v18  ;;  %v2340_v22 = vadd.f32 %v3304_v20, %v4116_v13  ;;  %v2331_v23 = vpop.f32.mrb[99].mxu0 }
 0x455   :  { %2584 = vst.msk [vmem:[%s4441_s3] sm:$0xff] %vm2583_vm2, %v2329_v19  ;;  %v2332_v25 = vadd.f32 %v4116_v13, %v2331_v23 }
 0x456   :  { %2587 = vst.msk [vmem:[%s4441_s3 + $0x18] sm:$0xff] %vm2583_vm2, %v2340_v22 }
 0x457   :  { %2585 = vst.msk [vmem:[%s4441_s3 + $0x8] sm:$0xff] %vm2583_vm2, %v2332_v25 }
 0x459   :  { %v3307_v26 = vpop.f32.mrb[100].mxu0 }
 0x45a   :  { %v2353_v27 = vadd.f32 %v3307_v26, %v4116_v13  ;;  %v2344_v28 = vpop.f32.mrb[101].mxu0 }
 0x45b   :  { %v2345_v29 = vadd.f32 %v4116_v13, %v2344_v28  ;;  %v3308_v30 = vpop.f32.mrb[102].mxu0 }
 0x45c   :  { %2590 = vst.msk [vmem:[%s4441_s3 + $0x30] sm:$0xff] %vm2583_vm2, %v2353_v27  ;;  %v2356_v37 = vadd.f32 %v3308_v30, %v4116_v13  ;;  %v2347_v24 = vpop.f32.mrb[103].mxu0 }
 0x45d   :  { %2588 = vst.msk [vmem:[%s4441_s3 + $0x20] sm:$0xff] %vm2583_vm2, %v2345_v29  ;;  %v2348_v50 = vadd.f32 %v4116_v13, %v2347_v24 }
 0x45e   :  { %2591 = vst.msk [vmem:[%s4441_s3 + $0x38] sm:$0xff] %vm2583_vm2, %v2356_v37 }
 0x45f   :  { %2589 = vst.msk [vmem:[%s4441_s3 + $0x28] sm:$0xff] %vm2583_vm2, %v2348_v50 }
 0x461   :  { %v3311_v53 = vpop.f32.mrb[104].mxu0 }
 0x462   :  { %v2369_v14 = vadd.f32 %v3311_v53, %v4116_v13  ;;  %v2360_v17 = vpop.f32.mrb[105].mxu0 }
 0x463   :  { %v2361_v45 = vadd.f32 %v4116_v13, %v2360_v17  ;;  %v3312_v48 = vpop.f32.mrb[106].mxu0 }
 0x464   :  { %2594 = vst.msk [vmem:[%s4441_s3 + $0x50] sm:$0xff] %vm2583_vm2, %v2369_v14  ;;  %v2372_v11 = vadd.f32 %v3312_v48, %v4116_v13  ;;  %v2363_v15 = vpop.f32.mrb[107].mxu0 }
 0x465   :  { %2592 = vst.msk [vmem:[%s4441_s3 + $0x40] sm:$0xff] %vm2583_vm2, %v2361_v45  ;;  %v2364_v31 = vadd.f32 %v4116_v13, %v2363_v15 }
 0x466   :  { %2595 = vst.msk [vmem:[%s4441_s3 + $0x58] sm:$0xff] %vm2583_vm2, %v2372_v11 }
 0x467   :  { %2593 = vst.msk [vmem:[%s4441_s3 + $0x48] sm:$0xff] %vm2583_vm2, %v2364_v31 }
 0x469   :  { %v3315_v32 = vpop.f32.mrb[108].mxu0 }
 0x46a   :  { %v2385_v33 = vadd.f32 %v3315_v32, %v4116_v13  ;;  %v2376_v34 = vpop.f32.mrb[109].mxu0 }
 0x46b   :  { %v2377_v35 = vadd.f32 %v4116_v13, %v2376_v34  ;;  %v3316_v38 = vpop.f32.mrb[110].mxu0 }
 0x46c   :  { %2598 = vst.msk [vmem:[%s4441_s3 + $0x70] sm:$0xff] %vm2583_vm2, %v2385_v33  ;;  %v2388_v39 = vadd.f32 %v3316_v38, %v4116_v13  ;;  %v2379_v40 = vpop.f32.mrb[111].mxu0 }
 0x46d   :  { %2596 = vst.msk [vmem:[%s4441_s3 + $0x60] sm:$0xff] %vm2583_vm2, %v2377_v35  ;;  %v2380_v21 = vadd.f32 %v4116_v13, %v2379_v40 }
 0x46e   :  { %2599 = vst.msk [vmem:[%s4441_s3 + $0x78] sm:$0xff] %vm2583_vm2, %v2388_v39 }
 0x46f   :  { %2597 = vst.msk [vmem:[%s4441_s3 + $0x68] sm:$0xff] %vm2583_vm2, %v2380_v21 }
 0x471   :  { %v3319_v41 = vpop.f32.mrb[112].mxu0 }
 0x472   :  { %v2401_v42 = vadd.f32 %v3319_v41, %v4116_v13  ;;  %v2392_v43 = vpop.f32.mrb[113].mxu0 }
 0x473   :  { %v2393_v44 = vadd.f32 %v4116_v13, %v2392_v43  ;;  %v3320_v46 = vpop.f32.mrb[114].mxu0 }
 0x474   :  { %2602 = vst.msk [vmem:[%s4441_s3 + $0x90] sm:$0xff] %vm2583_vm2, %v2401_v42  ;;  %v2404_v47 = vadd.f32 %v3320_v46, %v4116_v13  ;;  %v2395_v49 = vpop.f32.mrb[115].mxu0 }
 0x475   :  { %2600 = vst.msk [vmem:[%s4441_s3 + $0x80] sm:$0xff] %vm2583_vm2, %v2393_v44  ;;  %v2396_v51 = vadd.f32 %v4116_v13, %v2395_v49 }
 0x476   :  { %2603 = vst.msk [vmem:[%s4441_s3 + $0x98] sm:$0xff] %vm2583_vm2, %v2404_v47 }
 0x477   :  { %2601 = vst.msk [vmem:[%s4441_s3 + $0x88] sm:$0xff] %vm2583_vm2, %v2396_v51 }
 0x479   :  { %v3323_v52 = vpop.f32.mrb[116].mxu0 }
 0x47a   :  { %v2417_v54 = vadd.f32 %v3323_v52, %v4116_v13  ;;  %v2408_v55 = vpop.f32.mrb[117].mxu0 }
 0x47b   :  { %v2409_v56 = vadd.f32 %v4116_v13, %v2408_v55  ;;  %v3324_v57 = vpop.f32.mrb[118].mxu0 }
 0x47c   :  { %2606 = vst.msk [vmem:[%s4441_s3 + $0xb0] sm:$0xff] %vm2583_vm2, %v2417_v54  ;;  %v2420_v58 = vadd.f32 %v3324_v57, %v4116_v13  ;;  %v2411_v59 = vpop.f32.mrb[119].mxu0 }
 0x47d   :  { %2604 = vst.msk [vmem:[%s4441_s3 + $0xa0] sm:$0xff] %vm2583_vm2, %v2409_v56  ;;  %v2412_v60 = vadd.f32 %v4116_v13, %v2411_v59 }
 0x47e   :  { %2607 = vst.msk [vmem:[%s4441_s3 + $0xb8] sm:$0xff] %vm2583_vm2, %v2420_v58 }
 0x47f   :  { %2605 = vst.msk [vmem:[%s4441_s3 + $0xa8] sm:$0xff] %vm2583_vm2, %v2412_v60 }
 0x481   :  { %v3327_v61 = vpop.f32.mrb[120].mxu0 }
 0x482   :  { %v2433_v62 = vadd.f32 %v3327_v61, %v4116_v13  ;;  %v2424_v63 = vpop.f32.mrb[121].mxu0 }
 0x483   :  { %v2425_v0 = vadd.f32 %v4116_v13, %v2424_v63  ;;  %v3328_v1 = vpop.f32.mrb[122].mxu0 }
 0x484   :  { %2610 = vst.msk [vmem:[%s4441_s3 + $0xd0] sm:$0xff] %vm2583_vm2, %v2433_v62  ;;  %v2436_v2 = vadd.f32 %v3328_v1, %v4116_v13  ;;  %v2427_v3 = vpop.f32.mrb[123].mxu0 }
 0x485   :  { %2608 = vst.msk [vmem:[%s4441_s3 + $0xc0] sm:$0xff] %vm2583_vm2, %v2425_v0  ;;  %v2428_v4 = vadd.f32 %v4116_v13, %v2427_v3 }
 0x486   :  { %2611 = vst.msk [vmem:[%s4441_s3 + $0xd8] sm:$0xff] %vm2583_vm2, %v2436_v2 }
 0x487   :  { %2609 = vst.msk [vmem:[%s4441_s3 + $0xc8] sm:$0xff] %vm2583_vm2, %v2428_v4 }
 0x489   :  { %v3331_v5 = vpop.f32.mrb[124].mxu0 }
 0x48a   :  { %v2449_v6 = vadd.f32 %v3331_v5, %v4116_v13  ;;  %v2440_v7 = vpop.f32.mrb[125].mxu0 }
 0x48b   :  { %v2441_v8 = vadd.f32 %v4116_v13, %v2440_v7  ;;  %v3332_v9 = vpop.f32.mrb[126].mxu0 }
 0x48c   :  { %2614 = vst.msk [vmem:[%s4441_s3 + $0xf0] sm:$0xff] %vm2583_vm2, %v2449_v6  ;;  %v2452_v10 = vadd.f32 %v3332_v9, %v4116_v13  ;;  %v2443_v12 = vpop.f32.mrb[127].mxu0 }
 0x48d   :  { %2612 = vst.msk [vmem:[%s4441_s3 + $0xe0] sm:$0xff] %vm2583_vm2, %v2441_v8  ;;  %v2444_v16 = vadd.f32 %v4116_v13, %v2443_v12 }
 0x48e   :  { %2615 = vst.msk [vmem:[%s4441_s3 + $0xf8] sm:$0xff] %vm2583_vm2, %v2452_v10 }
 0x48f   :  { %2613 = vst.msk [vmem:[%s4441_s3 + $0xe8] sm:$0xff] %vm2583_vm2, %v2444_v16 }
 0x491   :  { %v3335_v18 = vpop.f32.mrb[128].mxu0 }
 0x492   :  { %v2465_v36 = vadd.f32 %v3335_v18, %v4116_v13  ;;  %v2456_v19 = vpop.f32.mrb[129].mxu0 }
 0x493   :  { %v2457_v20 = vadd.f32 %v4116_v13, %v2456_v19  ;;  %v3336_v22 = vpop.f32.mrb[130].mxu0 }
 0x494   :  { %2618 = vst.msk [vmem:[%s4441_s3 + $0x110] sm:$0xff] %vm2583_vm2, %v2465_v36  ;;  %v2468_v23 = vadd.f32 %v3336_v22, %v4116_v13  ;;  %v2459_v25 = vpop.f32.mrb[131].mxu0 }
 0x495   :  { %2616 = vst.msk [vmem:[%s4441_s3 + $0x100] sm:$0xff] %vm2583_vm2, %v2457_v20  ;;  %v2460_v26 = vadd.f32 %v4116_v13, %v2459_v25 }
 0x496   :  { %2619 = vst.msk [vmem:[%s4441_s3 + $0x118] sm:$0xff] %vm2583_vm2, %v2468_v23 }
 0x497   :  { %2617 = vst.msk [vmem:[%s4441_s3 + $0x108] sm:$0xff] %vm2583_vm2, %v2460_v26 }
 0x499   :  { %v3339_v27 = vpop.f32.mrb[132].mxu0 }
 0x49a   :  { %v2481_v28 = vadd.f32 %v3339_v27, %v4116_v13  ;;  %v2472_v29 = vpop.f32.mrb[133].mxu0 }
 0x49b   :  { %v2473_v30 = vadd.f32 %v4116_v13, %v2472_v29  ;;  %v3340_v37 = vpop.f32.mrb[134].mxu0 }
 0x49c   :  { %2622 = vst.msk [vmem:[%s4441_s3 + $0x130] sm:$0xff] %vm2583_vm2, %v2481_v28  ;;  %v2484_v24 = vadd.f32 %v3340_v37, %v4116_v13  ;;  %v2475_v50 = vpop.f32.mrb[135].mxu0 }
 0x49d   :  { %2620 = vst.msk [vmem:[%s4441_s3 + $0x120] sm:$0xff] %vm2583_vm2, %v2473_v30  ;;  %v2476_v53 = vadd.f32 %v4116_v13, %v2475_v50 }
 0x49e   :  { %2623 = vst.msk [vmem:[%s4441_s3 + $0x138] sm:$0xff] %vm2583_vm2, %v2484_v24 }
 0x49f   :  { %2621 = vst.msk [vmem:[%s4441_s3 + $0x128] sm:$0xff] %vm2583_vm2, %v2476_v53 }
 0x4a1   :  { %v3343_v14 = vpop.f32.mrb[136].mxu0 }
 0x4a2   :  { %v2497_v17 = vadd.f32 %v3343_v14, %v4116_v13  ;;  %v2488_v45 = vpop.f32.mrb[137].mxu0 }
 0x4a3   :  { %v2489_v48 = vadd.f32 %v4116_v13, %v2488_v45  ;;  %v3344_v11 = vpop.f32.mrb[138].mxu0 }
 0x4a4   :  { %2626 = vst.msk [vmem:[%s4441_s3 + $0x150] sm:$0xff] %vm2583_vm2, %v2497_v17  ;;  %v2500_v15 = vadd.f32 %v3344_v11, %v4116_v13  ;;  %v2491_v31 = vpop.f32.mrb[139].mxu0 }
 0x4a5   :  { %2624 = vst.msk [vmem:[%s4441_s3 + $0x140] sm:$0xff] %vm2583_vm2, %v2489_v48  ;;  %v2492_v32 = vadd.f32 %v4116_v13, %v2491_v31 }
 0x4a6   :  { %2627 = vst.msk [vmem:[%s4441_s3 + $0x158] sm:$0xff] %vm2583_vm2, %v2500_v15 }
 0x4a7   :  { %2625 = vst.msk [vmem:[%s4441_s3 + $0x148] sm:$0xff] %vm2583_vm2, %v2492_v32 }
 0x4a9   :  { %v3347_v33 = vpop.f32.mrb[140].mxu0 }
 0x4aa   :  { %v2513_v34 = vadd.f32 %v3347_v33, %v4116_v13  ;;  %v2504_v35 = vpop.f32.mrb[141].mxu0 }
 0x4ab   :  { %v2505_v38 = vadd.f32 %v4116_v13, %v2504_v35  ;;  %v3348_v39 = vpop.f32.mrb[142].mxu0 }
 0x4ac   :  { %2630 = vst.msk [vmem:[%s4441_s3 + $0x170] sm:$0xff] %vm2583_vm2, %v2513_v34  ;;  %v2516_v40 = vadd.f32 %v3348_v39, %v4116_v13  ;;  %v2507_v21 = vpop.f32.mrb[143].mxu0 }
 0x4ad   :  { %2628 = vst.msk [vmem:[%s4441_s3 + $0x160] sm:$0xff] %vm2583_vm2, %v2505_v38  ;;  %v2508_v41 = vadd.f32 %v4116_v13, %v2507_v21 }
 0x4ae   :  { %2631 = vst.msk [vmem:[%s4441_s3 + $0x178] sm:$0xff] %vm2583_vm2, %v2516_v40 }
 0x4af   :  { %2629 = vst.msk [vmem:[%s4441_s3 + $0x168] sm:$0xff] %vm2583_vm2, %v2508_v41 }
 0x4b1   :  { %v3351_v42 = vpop.f32.mrb[144].mxu0 }
 0x4b2   :  { %v2529_v43 = vadd.f32 %v3351_v42, %v4116_v13  ;;  %v2520_v44 = vpop.f32.mrb[145].mxu0 }
 0x4b3   :  { %v2521_v46 = vadd.f32 %v4116_v13, %v2520_v44  ;;  %v3352_v47 = vpop.f32.mrb[146].mxu0 }
 0x4b4   :  { %2634 = vst.msk [vmem:[%s4441_s3 + $0x190] sm:$0xff] %vm2583_vm2, %v2529_v43  ;;  %v2532_v49 = vadd.f32 %v3352_v47, %v4116_v13  ;;  %v2523_v51 = vpop.f32.mrb[147].mxu0 }
 0x4b5   :  { %2632 = vst.msk [vmem:[%s4441_s3 + $0x180] sm:$0xff] %vm2583_vm2, %v2521_v46  ;;  %v2524_v52 = vadd.f32 %v4116_v13, %v2523_v51 }
 0x4b6   :  { %2635 = vst.msk [vmem:[%s4441_s3 + $0x198] sm:$0xff] %vm2583_vm2, %v2532_v49 }
 0x4b7   :  { %2633 = vst.msk [vmem:[%s4441_s3 + $0x188] sm:$0xff] %vm2583_vm2, %v2524_v52 }
 0x4b9   :  { %v3355_v54 = vpop.f32.mrb[148].mxu0 }
 0x4ba   :  { %v2545_v55 = vadd.f32 %v3355_v54, %v4116_v13  ;;  %v2536_v56 = vpop.f32.mrb[149].mxu0 }
 0x4bb   :  { %v2537_v57 = vadd.f32 %v4116_v13, %v2536_v56  ;;  %v3356_v58 = vpop.f32.mrb[150].mxu0 }
 0x4bc   :  { %2638 = vst.msk [vmem:[%s4441_s3 + $0x1b0] sm:$0xff] %vm2583_vm2, %v2545_v55  ;;  %v2548_v59 = vadd.f32 %v3356_v58, %v4116_v13  ;;  %v2539_v60 = vpop.f32.mrb[151].mxu0 }
 0x4bd   :  { %2636 = vst.msk [vmem:[%s4441_s3 + $0x1a0] sm:$0xff] %vm2583_vm2, %v2537_v57  ;;  %v2540_v61 = vadd.f32 %v4116_v13, %v2539_v60 }
 0x4be   :  { %2639 = vst.msk [vmem:[%s4441_s3 + $0x1b8] sm:$0xff] %vm2583_vm2, %v2548_v59 }
 0x4bf   :  { %2637 = vst.msk [vmem:[%s4441_s3 + $0x1a8] sm:$0xff] %vm2583_vm2, %v2540_v61 }
 0x4c1   :  { %v3359_v62 = vpop.f32.mrb[152].mxu0 }
 0x4c2   :  { %v2561_v63 = vadd.f32 %v3359_v62, %v4116_v13  ;;  %v2552_v0 = vpop.f32.mrb[153].mxu0 }
 0x4c3   :  { %v2553_v1 = vadd.f32 %v4116_v13, %v2552_v0  ;;  %v3360_v2 = vpop.f32.mrb[154].mxu0 }
 0x4c4   :  { %2642 = vst.msk [vmem:[%s4441_s3 + $0x1d0] sm:$0xff] %vm2583_vm2, %v2561_v63  ;;  %v2564_v3 = vadd.f32 %v3360_v2, %v4116_v13  ;;  %v2555_v4 = vpop.f32.mrb[155].mxu0 }
 0x4c5   :  { %2640 = vst.msk [vmem:[%s4441_s3 + $0x1c0] sm:$0xff] %vm2583_vm2, %v2553_v1  ;;  %v2556_v5 = vadd.f32 %v4116_v13, %v2555_v4 }
 0x4c6   :  { %2643 = vst.msk [vmem:[%s4441_s3 + $0x1d8] sm:$0xff] %vm2583_vm2, %v2564_v3 }
 0x4c7   :  { %2641 = vst.msk [vmem:[%s4441_s3 + $0x1c8] sm:$0xff] %vm2583_vm2, %v2556_v5 }
 0x4c9   :  { %v3363_v6 = vpop.f32.mrb[156].mxu0 }
 0x4ca   :  { %v2577_v7 = vadd.f32 %v3363_v6, %v4116_v13  ;;  %v2568_v8 = vpop.f32.mrb[157].mxu0 }
 0x4cb   :  { %v2569_v9 = vadd.f32 %v4116_v13, %v2568_v8  ;;  %v3364_v10 = vpop.f32.mrb[158].mxu0 }
 0x4cc   :  { %2646 = vst.msk [vmem:[%s4441_s3 + $0x1f0] sm:$0xff] %vm2583_vm2, %v2577_v7  ;;  %v2580_v12 = vadd.f32 %v3364_v10, %v4116_v13  ;;  %v2571_v16 = vpop.f32.mrb[159].mxu0 }
 0x4cd   :  { %2644 = vst.msk [vmem:[%s4441_s3 + $0x1e0] sm:$0xff] %vm2583_vm2, %v2569_v9  ;;  %v2572_v18 = vadd.f32 %v4116_v13, %v2571_v16 }
 0x4ce   :  { %2647 = vst.msk [vmem:[%s4441_s3 + $0x1f8] sm:$0xff] %vm2583_vm2, %v2580_v12 }
 0x4cf   :  { %2645 = vst.msk [vmem:[%s4441_s3 + $0x1e8] sm:$0xff] %vm2583_vm2, %v2572_v18 }

</bundles_post_ra>
